<compile_context>
chip_gen: v7x
topology: tpu7x:2x2x1
jax: 0.10.0
libtpu: 0.0.40
codegen_flags: <defaults>
</compile_context>

<pallas_src>
import functools

import jax
import jax.numpy as jnp
from jax.experimental import pallas as pl
from jax.experimental.pallas import tpu as pltpu


def _round_up(n, m):
    return ((n + m - 1) // m) * m


def _resnet1d_kernel(x_ref, *refs, dilations, n_in, lane_pad, compute_dtype,
                     pack_taps):
    """refs = (w1_0, b1_0, w2_0, b2_0, ..., w1_{D-1}, ..., out_ref).

    x_ref / out_ref : (1, L, C)  -- one batch element, channels unpadded in HBM.
    pack_taps=True : w1_d is (128, Cm) with the 3 taps stacked on rows [0:3C).
    pack_taps=False: w1_d is (3, Cp, Cm), one (in, out) matmul operand per tap.
    b1_d : (1, Cm) f32     w2_d : (Cm, Cp)     b2_d : (1, Cp) f32
    """
    out_ref = refs[-1]
    param_refs = refs[:-1]
    C = n_in
    L = x_ref.shape[1]
    f32 = jnp.float32

    # Residual stream, channels zero-extended onto the lane axis (registers only).
    x = x_ref[0].astype(f32)                              # (L, C)
    if lane_pad > 0:
        x = jnp.concatenate([x, jnp.zeros((L, lane_pad), f32)], axis=-1)
    Cp = C + lane_pad                                     # lane width of container

    # Time (row) index, hoisted out of the depth loop (broadcasts are not CSE'd).
    t = jax.lax.broadcasted_iota(jnp.int32, (L, Cp), 0)

    for d, dil in enumerate(dilations):
        w1_ref, b1_ref, w2_ref, b2_ref = param_refs[4 * d: 4 * d + 4]

        h = jnp.maximum(x, 0.0)                           # pre-activation ReLU

        # Dilated +/-dil time shifts: XLU roll + VPU mask for the conv zero padding.
        s = dil % L
        h_m = jnp.where(t >= dil, pltpu.roll(h, s, axis=0), 0.0)           # h[t-dil]
        h_p = jnp.where(t < L - dil, pltpu.roll(h, (L - s) % L, axis=0), 0.0)  # h[t+dil]

        if pack_taps:
            # Pack the three taps into disjoint lane groups of one LHS; the adds are
            # cheap because each group's complement lanes are exactly zero.
            lhs = h_m + pltpu.roll(h, C, axis=1) + pltpu.roll(h_p, 2 * C, axis=1)
            acc = jnp.dot(lhs.astype(compute_dtype), w1_ref[...],
                          preferred_element_type=f32)
        else:
            acc = jnp.dot(h_m.astype(compute_dtype), w1_ref[0],
                          preferred_element_type=f32)
            acc = acc + jnp.dot(h.astype(compute_dtype), w1_ref[1],
                                preferred_element_type=f32)
            acc = acc + jnp.dot(h_p.astype(compute_dtype), w1_ref[2],
                                preferred_element_type=f32)
        acc = acc + b1_ref[...]

        h2 = jnp.maximum(acc, 0.0)                        # inner ReLU
        y = jnp.dot(h2.astype(compute_dtype), w2_ref[...],
                    preferred_element_type=f32)
        x = x + y + b2_ref[...]                           # 1x1-conv bias + residual

    out_ref[0] = x[:, :C].astype(out_ref.dtype)


def resnet1d_forward(x, params, dilations, compute_dtype=jnp.bfloat16):
    """x: (B, C, L) float32.
    params: list of (w1, b1, w2, b2) per block, in forward order:
        w1: (C_inner, C, 3), b1: (C_inner,), w2: (C, C_inner, 1), b2: (C,).
    dilations: list of python ints, same order as params.
    compute_dtype: dtype of the MXU inputs (accumulation & residual stay f32).
    """
    B, C, L = x.shape
    C_inner = params[0][0].shape[0]
    n_depth = len(params)

    pack_taps = (3 * C) <= 128
    Cp = 128 if pack_taps else _round_up(C, 128)   # in-kernel lane container width
    Cm = _round_up(C_inner, 128)                   # inner-channel lane width

    # Channels-last activations, unpadded in HBM.
    xt = jnp.transpose(x, (0, 2, 1))               # (B, L, C)

    flat_args = []
    in_specs = [pl.BlockSpec((1, L, C), lambda b: (b, 0, 0))]
    for (w1, b1, w2, b2) in params:
        if pack_taps:
            # (C_inner, C, 3) -> (3C, C_inner): taps stacked along the contraction
            # rows, zero-padded to one (128, Cm) MXU operand.
            w1rows = jnp.concatenate([w1[:, :, k].T for k in range(3)], axis=0)
            w1p = jnp.pad(w1rows, ((0, 128 - 3 * C), (0, Cm - C_inner)))
            w1_spec = pl.BlockSpec((128, Cm), lambda b: (0, 0))
        else:
            # (C_inner, C, 3) -> (3, Cp, Cm): per-tap (in, out) matmul operands.
            w1p = jnp.pad(jnp.transpose(w1, (2, 1, 0)),
                          ((0, 0), (0, Cp - C), (0, Cm - C_inner)))
            w1_spec = pl.BlockSpec((3, Cp, Cm), lambda b: (0, 0, 0))
        b1p = jnp.pad(b1, (0, Cm - C_inner)).reshape(1, Cm)
        w2p = jnp.pad(w2[:, :, 0].T, ((0, Cm - C_inner), (0, Cp - C)))
        b2p = jnp.pad(b2, (0, Cp - C)).reshape(1, Cp)

        flat_args += [w1p.astype(compute_dtype), b1p.astype(jnp.float32),
                      w2p.astype(compute_dtype), b2p.astype(jnp.float32)]
        in_specs += [w1_spec,
                     pl.BlockSpec((1, Cm), lambda b: (0, 0)),
                     pl.BlockSpec((Cm, Cp), lambda b: (0, 0)),
                     pl.BlockSpec((1, Cp), lambda b: (0, 0))]

    kernel = functools.partial(
        _resnet1d_kernel,
        dilations=tuple(int(d) for d in dilations),
        n_in=C, lane_pad=Cp - C, compute_dtype=compute_dtype,
        pack_taps=pack_taps)

    if pack_taps:
        mxu_flops_per_depth = 2 * L * (128 * Cm + Cm * Cp)
    else:
        mxu_flops_per_depth = 2 * L * (3 * Cp * Cm + Cm * Cp)
    weight_bytes = sum(int(a.size) * a.dtype.itemsize for a in flat_args)
    cost = pl.CostEstimate(
        flops=B * n_depth * mxu_flops_per_depth,
        transcendentals=0,
        bytes_accessed=2 * B * L * C * 4 + weight_bytes)

    out = pl.pallas_call(
        kernel,
        out_shape=jax.ShapeDtypeStruct((B, L, C), x.dtype),
        grid=(B,),
        in_specs=in_specs,
        out_specs=pl.BlockSpec((1, L, C), lambda b: (b, 0, 0)),
        compiler_params=pltpu.CompilerParams(
            dimension_semantics=("parallel",)),
        cost_estimate=cost,
    )(xt, *flat_args)

    return jnp.transpose(out, (0, 2, 1))


def init_resnet1d_params(key, n_in, n_depth, m_conv=1.0,
                         dilation_growth_rate=3, reverse_dilation=False):
    """Deterministic synthetic init mimicking nn.Conv1d (uniform +-1/sqrt(fan_in))."""
    c_inner = int(m_conv * n_in)
    params, dilations = [], []
    for depth in range(n_depth):
        dil = dilation_growth_rate ** depth
        key, k1, k2, k3, k4 = jax.random.split(key, 5)
        bound1 = 1.0 / jnp.sqrt(n_in * 3.0)
        w1 = jax.random.uniform(k1, (c_inner, n_in, 3), jnp.float32, -bound1, bound1)
        b1 = jax.random.uniform(k2, (c_inner,), jnp.float32, -bound1, bound1)
        bound2 = 1.0 / jnp.sqrt(c_inner * 1.0)
        w2 = jax.random.uniform(k3, (n_in, c_inner, 1), jnp.float32, -bound2, bound2)
        b2 = jax.random.uniform(k4, (n_in,), jnp.float32, -bound2, bound2)
        params.append((w1, b1, w2, b2))
        dilations.append(dil)
    if reverse_dilation:
        params = params[::-1]
        dilations = dilations[::-1]
    return params, dilations


def resnet1d_reference(x, params, dilations):
    """Pure-JAX reference matching the PyTorch forward (for correctness check)."""
    for (w1, b1, w2, b2), dil in zip(params, dilations):
        h = jnp.maximum(x, 0.0)
        h = jax.lax.conv_general_dilated(
            h, w1, window_strides=(1,), padding=[(dil, dil)],
            rhs_dilation=(dil,), dimension_numbers=("NCH", "OIH", "NCH"))
        h = h + b1[None, :, None]
        h = jnp.maximum(h, 0.0)
        h = jax.lax.conv_general_dilated(
            h, w2, window_strides=(1,), padding=[(0, 0)],
            dimension_numbers=("NCH", "OIH", "NCH"))
        h = h + b2[None, :, None]
        x = x + h
    return x


if __name__ == "__main__":
    # Shapes consistent with the module: Resnet1D(n_in=32, n_depth=3, m_conv=1.0,
    # dilation_growth_rate=3) on (batch=2, channels=32, length=64).
    batch, n_in, length = 2, 32, 64
    n_depth, growth = 3, 3                           # dilations 1, 3, 9

    key = jax.random.PRNGKey(0)
    key, kx = jax.random.split(key)
    x = jax.random.normal(kx, (batch, n_in, length), jnp.float32)

    params, dilations = init_resnet1d_params(
        key, n_in, n_depth, m_conv=1.0, dilation_growth_rate=growth,
        reverse_dilation=False)

    ref = resnet1d_reference(x, params, dilations)

    # Exact path: f32 MXU inputs, tight tolerance.
    out_f32 = resnet1d_forward(x, params, dilations, compute_dtype=jnp.float32)
    jax.block_until_ready(out_f32)
    assert out_f32.shape == ref.shape
    assert jnp.allclose(out_f32, ref, atol=1e-4, rtol=1e-4), "f32 mismatch vs reference"

    # Default fast path: bf16 MXU inputs, f32 accumulation / residual stream.
    out_bf16 = resnet1d_forward(x, params, dilations)
    jax.block_until_ready(out_bf16)
    assert jnp.allclose(out_bf16, ref, atol=5e-2, rtol=5e-2), "bf16 mismatch vs reference"

    # Second config: narrower inner width (m_conv=0.5), reversed dilations, odd batch.
    key2 = jax.random.PRNGKey(1)
    key2, kx2 = jax.random.split(key2)
    x2 = jax.random.normal(kx2, (3, 32, 128), jnp.float32)
    params2, dil2 = init_resnet1d_params(
        key2, 32, 2, m_conv=0.5, dilation_growth_rate=3, reverse_dilation=True)
    out2 = resnet1d_forward(x2, params2, dil2, compute_dtype=jnp.float32)
    jax.block_until_ready(out2)
    ref2 = resnet1d_reference(x2, params2, dil2)
    assert jnp.allclose(out2, ref2, atol=1e-4, rtol=1e-4), "config-2 mismatch vs reference"

    print("KERNEL_OK")
</pallas_src>

<mosaic_0001>
module attributes {stable_mosaic.version = 11 : i64} {
  func.func @_resnet1d_kernel(%arg0: i32, %arg1: memref<1x64x32xf32, #tpu.memory_space<vmem>>, %arg2: memref<128x128xf32, #tpu.memory_space<vmem>>, %arg3: memref<1x128xf32, #tpu.memory_space<vmem>>, %arg4: memref<128x128xf32, #tpu.memory_space<vmem>>, %arg5: memref<1x128xf32, #tpu.memory_space<vmem>>, %arg6: memref<128x128xf32, #tpu.memory_space<vmem>>, %arg7: memref<1x128xf32, #tpu.memory_space<vmem>>, %arg8: memref<128x128xf32, #tpu.memory_space<vmem>>, %arg9: memref<1x128xf32, #tpu.memory_space<vmem>>, %arg10: memref<128x128xf32, #tpu.memory_space<vmem>>, %arg11: memref<1x128xf32, #tpu.memory_space<vmem>>, %arg12: memref<128x128xf32, #tpu.memory_space<vmem>>, %arg13: memref<1x128xf32, #tpu.memory_space<vmem>>, %arg14: memref<1x64x32xf32, #tpu.memory_space<vmem>>) attributes {dimension_semantics = [#tpu.dimension_semantics<parallel>], iteration_bounds = array<i64: 2>, scalar_prefetch = 0 : i64, scratch_operands = 0 : i64, tpu.core_type = #tpu.core_type<tc>, window_params = [{transform_indices = @transform_0, window_bounds = array<i64: 1, 64, 32>}, {pipeline_mode = #tpu.pipeline_mode<synchronous>, transform_indices = @transform_1, window_bounds = array<i64: 128, 128>}, {pipeline_mode = #tpu.pipeline_mode<synchronous>, transform_indices = @transform_2, window_bounds = array<i64: 1, 128>}, {pipeline_mode = #tpu.pipeline_mode<synchronous>, transform_indices = @transform_3, window_bounds = array<i64: 128, 128>}, {pipeline_mode = #tpu.pipeline_mode<synchronous>, transform_indices = @transform_4, window_bounds = array<i64: 1, 128>}, {pipeline_mode = #tpu.pipeline_mode<synchronous>, transform_indices = @transform_5, window_bounds = array<i64: 128, 128>}, {pipeline_mode = #tpu.pipeline_mode<synchronous>, transform_indices = @transform_6, window_bounds = array<i64: 1, 128>}, {pipeline_mode = #tpu.pipeline_mode<synchronous>, transform_indices = @transform_7, window_bounds = array<i64: 128, 128>}, {pipeline_mode = #tpu.pipeline_mode<synchronous>, transform_indices = @transform_8, window_bounds = array<i64: 1, 128>}, {pipeline_mode = #tpu.pipeline_mode<synchronous>, transform_indices = @transform_9, window_bounds = array<i64: 128, 128>}, {pipeline_mode = #tpu.pipeline_mode<synchronous>, transform_indices = @transform_10, window_bounds = array<i64: 1, 128>}, {pipeline_mode = #tpu.pipeline_mode<synchronous>, transform_indices = @transform_11, window_bounds = array<i64: 128, 128>}, {pipeline_mode = #tpu.pipeline_mode<synchronous>, transform_indices = @transform_12, window_bounds = array<i64: 1, 128>}, {transform_indices = @transform_13, window_bounds = array<i64: 1, 64, 32>}]} {
    %c0 = arith.constant 0 : index
    %c0_0 = arith.constant 0 : index
    %c0_1 = arith.constant 0 : index
    %0 = vector.load %arg1[%c0, %c0_0, %c0_1] : memref<1x64x32xf32, #tpu.memory_space<vmem>>, vector<1x64x32xf32>
    %1 = vector.shape_cast %0 : vector<1x64x32xf32> to vector<64x32xf32>
    %cst = arith.constant 0.000000e+00 : f32
    %2 = vector.broadcast %cst : f32 to vector<64x96xf32>
    %3 = tpu.concatenate %1, %2 in 1 : vector<64x32xf32>, vector<64x96xf32> -> vector<64x128xf32>
    %4 = tpu.iota {dimensions = array<i32: 0>} : vector<64x128xi32>
    %cst_2 = arith.constant 0.000000e+00 : f32
    %5 = vector.broadcast %cst_2 : f32 to vector<64x128xf32>
    %6 = arith.maximumf %3, %5 : vector<64x128xf32>
    %c1_i32 = arith.constant 1 : i32
    %7 = vector.broadcast %c1_i32 : i32 to vector<64x128xi32>
    %8 = arith.cmpi sge, %4, %7 : vector<64x128xi32>
    %c1_i32_3 = arith.constant 1 : i32
    %9 = tpu.dynamic_rotate %6 by %c1_i32_3 dim 0 : vector<64x128xf32>, i32 -> vector<64x128xf32>
    %cst_4 = arith.constant 0.000000e+00 : f32
    %10 = vector.broadcast %cst_4 : f32 to vector<64x128xf32>
    %11 = arith.select %8, %9, %10 : vector<64x128xi1>, vector<64x128xf32>
    %c63_i32 = arith.constant 63 : i32
    %12 = vector.broadcast %c63_i32 : i32 to vector<64x128xi32>
    %13 = arith.cmpi slt, %4, %12 : vector<64x128xi32>
    %c63_i32_5 = arith.constant 63 : i32
    %14 = tpu.dynamic_rotate %6 by %c63_i32_5 dim 0 : vector<64x128xf32>, i32 -> vector<64x128xf32>
    %cst_6 = arith.constant 0.000000e+00 : f32
    %15 = vector.broadcast %cst_6 : f32 to vector<64x128xf32>
    %16 = arith.select %13, %14, %15 : vector<64x128xi1>, vector<64x128xf32>
    %c32_i32 = arith.constant 32 : i32
    %17 = tpu.dynamic_rotate %6 by %c32_i32 dim 1 : vector<64x128xf32>, i32 -> vector<64x128xf32>
    %18 = arith.addf %11, %17 : vector<64x128xf32>
    %c64_i32 = arith.constant 64 : i32
    %19 = tpu.dynamic_rotate %16 by %c64_i32 dim 1 : vector<64x128xf32>, i32 -> vector<64x128xf32>
    %20 = arith.addf %18, %19 : vector<64x128xf32>
    %c0_7 = arith.constant 0 : index
    %c0_8 = arith.constant 0 : index
    %21 = vector.load %arg2[%c0_7, %c0_8] : memref<128x128xf32, #tpu.memory_space<vmem>>, vector<128x128xf32>
    %cst_9 = arith.constant dense<0.000000e+00> : vector<64x128xf32>
    %22 = tpu.matmul %20, %21, %cst_9 {dimension_numbers = #tpu.dot_dimension_numbers<[1], [0], [0], [1], [0, 0, 1, 1], [], []>} : vector<64x128xf32>, vector<128x128xf32>, vector<64x128xf32> -> vector<64x128xf32>
    %c0_10 = arith.constant 0 : index
    %c0_11 = arith.constant 0 : index
    %23 = vector.load %arg3[%c0_10, %c0_11] : memref<1x128xf32, #tpu.memory_space<vmem>>, vector<1x128xf32>
    %24 = vector.broadcast %23 : vector<1x128xf32> to vector<64x128xf32>
    %25 = arith.addf %22, %24 : vector<64x128xf32>
    %cst_12 = arith.constant 0.000000e+00 : f32
    %26 = vector.broadcast %cst_12 : f32 to vector<64x128xf32>
    %27 = arith.maximumf %25, %26 : vector<64x128xf32>
    %c0_13 = arith.constant 0 : index
    %c0_14 = arith.constant 0 : index
    %28 = vector.load %arg4[%c0_13, %c0_14] : memref<128x128xf32, #tpu.memory_space<vmem>>, vector<128x128xf32>
    %cst_15 = arith.constant dense<0.000000e+00> : vector<64x128xf32>
    %29 = tpu.matmul %27, %28, %cst_15 {dimension_numbers = #tpu.dot_dimension_numbers<[1], [0], [0], [1], [0, 0, 1, 1], [], []>} : vector<64x128xf32>, vector<128x128xf32>, vector<64x128xf32> -> vector<64x128xf32>
    %30 = arith.addf %3, %29 : vector<64x128xf32>
    %c0_16 = arith.constant 0 : index
    %c0_17 = arith.constant 0 : index
    %31 = vector.load %arg5[%c0_16, %c0_17] : memref<1x128xf32, #tpu.memory_space<vmem>>, vector<1x128xf32>
    %32 = vector.broadcast %31 : vector<1x128xf32> to vector<64x128xf32>
    %33 = arith.addf %30, %32 : vector<64x128xf32>
    %cst_18 = arith.constant 0.000000e+00 : f32
    %34 = vector.broadcast %cst_18 : f32 to vector<64x128xf32>
    %35 = arith.maximumf %33, %34 : vector<64x128xf32>
    %c3_i32 = arith.constant 3 : i32
    %36 = vector.broadcast %c3_i32 : i32 to vector<64x128xi32>
    %37 = arith.cmpi sge, %4, %36 : vector<64x128xi32>
    %c3_i32_19 = arith.constant 3 : i32
    %38 = tpu.dynamic_rotate %35 by %c3_i32_19 dim 0 : vector<64x128xf32>, i32 -> vector<64x128xf32>
    %cst_20 = arith.constant 0.000000e+00 : f32
    %39 = vector.broadcast %cst_20 : f32 to vector<64x128xf32>
    %40 = arith.select %37, %38, %39 : vector<64x128xi1>, vector<64x128xf32>
    %c61_i32 = arith.constant 61 : i32
    %41 = vector.broadcast %c61_i32 : i32 to vector<64x128xi32>
    %42 = arith.cmpi slt, %4, %41 : vector<64x128xi32>
    %c61_i32_21 = arith.constant 61 : i32
    %43 = tpu.dynamic_rotate %35 by %c61_i32_21 dim 0 : vector<64x128xf32>, i32 -> vector<64x128xf32>
    %cst_22 = arith.constant 0.000000e+00 : f32
    %44 = vector.broadcast %cst_22 : f32 to vector<64x128xf32>
    %45 = arith.select %42, %43, %44 : vector<64x128xi1>, vector<64x128xf32>
    %c32_i32_23 = arith.constant 32 : i32
    %46 = tpu.dynamic_rotate %35 by %c32_i32_23 dim 1 : vector<64x128xf32>, i32 -> vector<64x128xf32>
    %47 = arith.addf %40, %46 : vector<64x128xf32>
    %c64_i32_24 = arith.constant 64 : i32
    %48 = tpu.dynamic_rotate %45 by %c64_i32_24 dim 1 : vector<64x128xf32>, i32 -> vector<64x128xf32>
    %49 = arith.addf %47, %48 : vector<64x128xf32>
    %c0_25 = arith.constant 0 : index
    %c0_26 = arith.constant 0 : index
    %50 = vector.load %arg6[%c0_25, %c0_26] : memref<128x128xf32, #tpu.memory_space<vmem>>, vector<128x128xf32>
    %cst_27 = arith.constant dense<0.000000e+00> : vector<64x128xf32>
    %51 = tpu.matmul %49, %50, %cst_27 {dimension_numbers = #tpu.dot_dimension_numbers<[1], [0], [0], [1], [0, 0, 1, 1], [], []>} : vector<64x128xf32>, vector<128x128xf32>, vector<64x128xf32> -> vector<64x128xf32>
    %c0_28 = arith.constant 0 : index
    %c0_29 = arith.constant 0 : index
    %52 = vector.load %arg7[%c0_28, %c0_29] : memref<1x128xf32, #tpu.memory_space<vmem>>, vector<1x128xf32>
    %53 = vector.broadcast %52 : vector<1x128xf32> to vector<64x128xf32>
    %54 = arith.addf %51, %53 : vector<64x128xf32>
    %cst_30 = arith.constant 0.000000e+00 : f32
    %55 = vector.broadcast %cst_30 : f32 to vector<64x128xf32>
    %56 = arith.maximumf %54, %55 : vector<64x128xf32>
    %c0_31 = arith.constant 0 : index
    %c0_32 = arith.constant 0 : index
    %57 = vector.load %arg8[%c0_31, %c0_32] : memref<128x128xf32, #tpu.memory_space<vmem>>, vector<128x128xf32>
    %cst_33 = arith.constant dense<0.000000e+00> : vector<64x128xf32>
    %58 = tpu.matmul %56, %57, %cst_33 {dimension_numbers = #tpu.dot_dimension_numbers<[1], [0], [0], [1], [0, 0, 1, 1], [], []>} : vector<64x128xf32>, vector<128x128xf32>, vector<64x128xf32> -> vector<64x128xf32>
    %59 = arith.addf %33, %58 : vector<64x128xf32>
    %c0_34 = arith.constant 0 : index
    %c0_35 = arith.constant 0 : index
    %60 = vector.load %arg9[%c0_34, %c0_35] : memref<1x128xf32, #tpu.memory_space<vmem>>, vector<1x128xf32>
    %61 = vector.broadcast %60 : vector<1x128xf32> to vector<64x128xf32>
    %62 = arith.addf %59, %61 : vector<64x128xf32>
    %cst_36 = arith.constant 0.000000e+00 : f32
    %63 = vector.broadcast %cst_36 : f32 to vector<64x128xf32>
    %64 = arith.maximumf %62, %63 : vector<64x128xf32>
    %c9_i32 = arith.constant 9 : i32
    %65 = vector.broadcast %c9_i32 : i32 to vector<64x128xi32>
    %66 = arith.cmpi sge, %4, %65 : vector<64x128xi32>
    %c9_i32_37 = arith.constant 9 : i32
    %67 = tpu.dynamic_rotate %64 by %c9_i32_37 dim 0 : vector<64x128xf32>, i32 -> vector<64x128xf32>
    %cst_38 = arith.constant 0.000000e+00 : f32
    %68 = vector.broadcast %cst_38 : f32 to vector<64x128xf32>
    %69 = arith.select %66, %67, %68 : vector<64x128xi1>, vector<64x128xf32>
    %c55_i32 = arith.constant 55 : i32
    %70 = vector.broadcast %c55_i32 : i32 to vector<64x128xi32>
    %71 = arith.cmpi slt, %4, %70 : vector<64x128xi32>
    %c55_i32_39 = arith.constant 55 : i32
    %72 = tpu.dynamic_rotate %64 by %c55_i32_39 dim 0 : vector<64x128xf32>, i32 -> vector<64x128xf32>
    %cst_40 = arith.constant 0.000000e+00 : f32
    %73 = vector.broadcast %cst_40 : f32 to vector<64x128xf32>
    %74 = arith.select %71, %72, %73 : vector<64x128xi1>, vector<64x128xf32>
    %c32_i32_41 = arith.constant 32 : i32
    %75 = tpu.dynamic_rotate %64 by %c32_i32_41 dim 1 : vector<64x128xf32>, i32 -> vector<64x128xf32>
    %76 = arith.addf %69, %75 : vector<64x128xf32>
    %c64_i32_42 = arith.constant 64 : i32
    %77 = tpu.dynamic_rotate %74 by %c64_i32_42 dim 1 : vector<64x128xf32>, i32 -> vector<64x128xf32>
    %78 = arith.addf %76, %77 : vector<64x128xf32>
    %c0_43 = arith.constant 0 : index
    %c0_44 = arith.constant 0 : index
    %79 = vector.load %arg10[%c0_43, %c0_44] : memref<128x128xf32, #tpu.memory_space<vmem>>, vector<128x128xf32>
    %cst_45 = arith.constant dense<0.000000e+00> : vector<64x128xf32>
    %80 = tpu.matmul %78, %79, %cst_45 {dimension_numbers = #tpu.dot_dimension_numbers<[1], [0], [0], [1], [0, 0, 1, 1], [], []>} : vector<64x128xf32>, vector<128x128xf32>, vector<64x128xf32> -> vector<64x128xf32>
    %c0_46 = arith.constant 0 : index
    %c0_47 = arith.constant 0 : index
    %81 = vector.load %arg11[%c0_46, %c0_47] : memref<1x128xf32, #tpu.memory_space<vmem>>, vector<1x128xf32>
    %82 = vector.broadcast %81 : vector<1x128xf32> to vector<64x128xf32>
    %83 = arith.addf %80, %82 : vector<64x128xf32>
    %cst_48 = arith.constant 0.000000e+00 : f32
    %84 = vector.broadcast %cst_48 : f32 to vector<64x128xf32>
    %85 = arith.maximumf %83, %84 : vector<64x128xf32>
    %c0_49 = arith.constant 0 : index
    %c0_50 = arith.constant 0 : index
    %86 = vector.load %arg12[%c0_49, %c0_50] : memref<128x128xf32, #tpu.memory_space<vmem>>, vector<128x128xf32>
    %cst_51 = arith.constant dense<0.000000e+00> : vector<64x128xf32>
    %87 = tpu.matmul %85, %86, %cst_51 {dimension_numbers = #tpu.dot_dimension_numbers<[1], [0], [0], [1], [0, 0, 1, 1], [], []>} : vector<64x128xf32>, vector<128x128xf32>, vector<64x128xf32> -> vector<64x128xf32>
    %88 = arith.addf %62, %87 : vector<64x128xf32>
    %c0_52 = arith.constant 0 : index
    %c0_53 = arith.constant 0 : index
    %89 = vector.load %arg13[%c0_52, %c0_53] : memref<1x128xf32, #tpu.memory_space<vmem>>, vector<1x128xf32>
    %90 = vector.broadcast %89 : vector<1x128xf32> to vector<64x128xf32>
    %91 = arith.addf %88, %90 : vector<64x128xf32>
    %92 = vector.extract_strided_slice %91 {offsets = [0, 0], sizes = [64, 32], strides = [1, 1]} : vector<64x128xf32> to vector<64x32xf32>
    %c0_54 = arith.constant 0 : index
    %c0_55 = arith.constant 0 : index
    %c0_56 = arith.constant 0 : index
    %93 = vector.load %arg14[%c0_54, %c0_55, %c0_56] : memref<1x64x32xf32, #tpu.memory_space<vmem>>, vector<1x64x32xf32>
    %94 = vector.shape_cast %93 : vector<1x64x32xf32> to vector<64x32xf32>
    %95 = vector.shape_cast %92 : vector<64x32xf32> to vector<1x64x32xf32>
    tpu.vector_store %arg14[%c0_54, %c0_55, %c0_56], %95 {strides = array<i32>} : memref<1x64x32xf32, #tpu.memory_space<vmem>>, vector<1x64x32xf32>,
    return
  }
  func.func @transform_0(%arg0: i32) -> (i32, i32, i32) {
    %c0_i32 = arith.constant 0 : i32
    %c0_i32_0 = arith.constant 0 : i32
    %c0_i32_1 = arith.constant 0 : i32
    return %arg0, %c0_i32, %c0_i32_0 : i32, i32, i32
  }
  func.func @transform_1(%arg0: i32) -> (i32, i32) {
    %c0_i32 = arith.constant 0 : i32
    %c0_i32_0 = arith.constant 0 : i32
    %c0_i32_1 = arith.constant 0 : i32
    return %c0_i32, %c0_i32_0 : i32, i32
  }
  func.func @transform_2(%arg0: i32) -> (i32, i32) {
    %c0_i32 = arith.constant 0 : i32
    %c0_i32_0 = arith.constant 0 : i32
    %c0_i32_1 = arith.constant 0 : i32
    return %c0_i32, %c0_i32_0 : i32, i32
  }
  func.func @transform_3(%arg0: i32) -> (i32, i32) {
    %c0_i32 = arith.constant 0 : i32
    %c0_i32_0 = arith.constant 0 : i32
    %c0_i32_1 = arith.constant 0 : i32
    return %c0_i32, %c0_i32_0 : i32, i32
  }
  func.func @transform_4(%arg0: i32) -> (i32, i32) {
    %c0_i32 = arith.constant 0 : i32
    %c0_i32_0 = arith.constant 0 : i32
    %c0_i32_1 = arith.constant 0 : i32
    return %c0_i32, %c0_i32_0 : i32, i32
  }
  func.func @transform_5(%arg0: i32) -> (i32, i32) {
    %c0_i32 = arith.constant 0 : i32
    %c0_i32_0 = arith.constant 0 : i32
    %c0_i32_1 = arith.constant 0 : i32
    return %c0_i32, %c0_i32_0 : i32, i32
  }
  func.func @transform_6(%arg0: i32) -> (i32, i32) {
    %c0_i32 = arith.constant 0 : i32
    %c0_i32_0 = arith.constant 0 : i32
    %c0_i32_1 = arith.constant 0 : i32
    return %c0_i32, %c0_i32_0 : i32, i32
  }
  func.func @transform_7(%arg0: i32) -> (i32, i32) {
    %c0_i32 = arith.constant 0 : i32
    %c0_i32_0 = arith.constant 0 : i32
    %c0_i32_1 = arith.constant 0 : i32
    return %c0_i32, %c0_i32_0 : i32, i32
  }
  func.func @transform_8(%arg0: i32) -> (i32, i32) {
    %c0_i32 = arith.constant 0 : i32
    %c0_i32_0 = arith.constant 0 : i32
    %c0_i32_1 = arith.constant 0 : i32
    return %c0_i32, %c0_i32_0 : i32, i32
  }
  func.func @transform_9(%arg0: i32) -> (i32, i32) {
    %c0_i32 = arith.constant 0 : i32
    %c0_i32_0 = arith.constant 0 : i32
    %c0_i32_1 = arith.constant 0 : i32
    return %c0_i32, %c0_i32_0 : i32, i32
  }
  func.func @transform_10(%arg0: i32) -> (i32, i32) {
    %c0_i32 = arith.constant 0 : i32
    %c0_i32_0 = arith.constant 0 : i32
    %c0_i32_1 = arith.constant 0 : i32
    return %c0_i32, %c0_i32_0 : i32, i32
  }
  func.func @transform_11(%arg0: i32) -> (i32, i32) {
    %c0_i32 = arith.constant 0 : i32
    %c0_i32_0 = arith.constant 0 : i32
    %c0_i32_1 = arith.constant 0 : i32
    return %c0_i32, %c0_i32_0 : i32, i32
  }
  func.func @transform_12(%arg0: i32) -> (i32, i32) {
    %c0_i32 = arith.constant 0 : i32
    %c0_i32_0 = arith.constant 0 : i32
    %c0_i32_1 = arith.constant 0 : i32
    return %c0_i32, %c0_i32_0 : i32, i32
  }
  func.func @transform_13(%arg0: i32) -> (i32, i32, i32) {
    %c0_i32 = arith.constant 0 : i32
    %c0_i32_0 = arith.constant 0 : i32
    %c0_i32_1 = arith.constant 0 : i32
    return %arg0, %c0_i32, %c0_i32_0 : i32, i32, i32
  }
}

</mosaic_0001>

<bundles_post_ra>
// kernel: tpu_custom_call.1
= control target key start
LH: loop header
LB: loop body
LE: loop exit
PB: predicated region body
PF: predicated region fallthrough
CT: control target
= control target key end

     0   :  { %s3433_s0 = inlined_call_operand.vmem [shape: f32[2,64,32], index: 0, kind: input, shape index: {}]   ;;  %s3434_s1 = inlined_call_operand.vmem [shape: f32[128,128], index: 1, kind: input, shape index: {}]   ;;  %s3435_s2 = inlined_call_operand.vmem [shape: f32[1,128], index: 2, kind: input, shape index: {}]   ;;  %s3436_s3 = inlined_call_operand.hbm [shape: f32[128,128], index: 3, kind: input, shape index: {}]   ;;  %s3437_s4 = inlined_call_operand.vmem [shape: f32[1,128], index: 4, kind: input, shape index: {}]   ;;  %s3438_s5 = inlined_call_operand.hbm [shape: f32[128,128], index: 5, kind: input, shape index: {}]   ;;  %s3439_s6 = inlined_call_operand.vmem [shape: f32[1,128], index: 6, kind: input, shape index: {}]   ;;  %s3440_s7 = inlined_call_operand.hbm [shape: f32[128,128], index: 7, kind: input, shape index: {}]   ;;  %s3441_s8 = inlined_call_operand.vmem [shape: f32[1,128], index: 8, kind: input, shape index: {}]   ;;  %s3442_s9 = inlined_call_operand.hbm [shape: f32[128,128], index: 9, kind: input, shape index: {}]   ;;  %s3443_s10 = inlined_call_operand.vmem [shape: f32[1,128], index: 10, kind: input, shape index: {}]   ;;  %s3444_s11 = inlined_call_operand.hbm [shape: f32[128,128], index: 11, kind: input, shape index: {}]   ;;  %s3445_s12 = inlined_call_operand.vmem [shape: f32[1,128], index: 12, kind: input, shape index: {}]   ;;  %s3446_s13 = inlined_call_operand.vmem [shape: f32[2,64,32], index: 13, kind: output, shape index: {}]  }
   0x1   :  { %3450 = sst [smem:[#allocation14_spill]] %s3445_s12 }
   0x2   :  { %3451 = sst [smem:[#allocation15_spill]] %s3446_s13 }
   0x3   :  { %18 = vsyncpa [#allocation3], 0 }
   0x4   :  { %19 = vsyncpa [#allocation5], 0 }
   0x5   :  { %20 = vsyncpa [#allocation8], 0  ;;  %s2790_s25 = smov 0  }
   0x6 LB: > { %3452 = sst [smem:[#allocation13_spill]] %s2708_s25  ;;  %s2796_s26 = sadd.s32 4294967295, %s2708_s25   ;;  %s2708_s25 = sphi %s2790_s25, %s26_s25  }
   0x7   : > { %p1859_p0 = scmp.ge.s32.totalorder %s2708_s25, 1  ;;  %p335_p1 = scmp.lt.s32.totalorder %s2708_s25, 3 }
   0x8   : > { %p3448_p2 = scmp.eq.s32.totalorder %s2796_s26, 0  ;;  %s2710_s28 = smov [#allocation4]  }
   0x9   : > { %p2801_p3 = pnand %p1859_p0, %p335_p1  ;;  %s369_s29 = sshll.u32 %s2710_s28, 4  ;;  %s2805_s29 = int_to_ptr.vmem [resolvable:$true] %s369_s29 }
   0xa   : > { %s2711_s30 = smov [#allocation7]   ;;  %s2712_s16 = smov [#allocation2]  }
   0xb   : > { %s3453_s27 = scalar_select %p2801_p3, 1, 0 }
   0xc   : > { %p2506_p4 = pneg %p2801_p3  ;;  %s401_s14 = sshll.u32 %s2711_s30, 4  ;;  %s2809_s14 = int_to_ptr.vmem [resolvable:$true] %s401_s14 }
   0xd   : > { %s353_s17 = sshll.u32 %s2712_s16, 4  ;;  %s2713_s18 = smov [#allocation6]   ;;  %s2817_s17 = int_to_ptr.vmem [resolvable:$true] %s353_s17 }
   0xe   : > { %p2813_p5 = pnand %p3448_p2, %p2506_p4  ;;  %s2819_s19 = sshll.u32 %s2713_s18, 4  ;;  %s386_s19 = int_to_ptr.vmem [resolvable:$true] %s2819_s19 }
   0xf   : > { %s2550_s22 = scalar_lea.hbm %s3438_s5, 2048 }
  0x10   : > { %p2551_p6 = scmp.ne.s32.totalorder %s3438_s5, %s2550_s22  ;;  %p2829_p7 = pneg %p2813_p5 }
  0x11   : > { %p2557_p10 = scmp.lt.u32.totalorder %s2550_s22, %s3438_s5 }
  0x12   : > { %p2553_p8 = pnand %p2829_p7, %p2551_p6 }
  0x14   : > { %p2554_p9 = pneg %p2553_p8 }
  0x16   : > { %p2559_p11 = pnand %p2557_p10, %p2554_p9 }
  0x18   : > { %2562 = shalt.err (!%p2559_p11)
}
  0x19   : > { %s2563_s18 = scalar_lea.vmem %s2805_s29, 2048  ;;  %p2571_p1 = scmp.lt.s32.totalorder %s2805_s29, %s2805_s29 }
  0x1a   : > { %p2564_p12 = scmp.ne.s32.totalorder %s2805_s29, %s2563_s18  ;;  %p2572_p4 = scmp.lt.s32.totalorder %s2563_s18, %s2563_s18 }
  0x1c   : > { %p2566_p13 = pnand %p2564_p12, %p2829_p7  ;;  %p2573_p6 = por %p2572_p4, %p2571_p1 }
  0x1e   : > { %p2567_p0 = pneg %p2566_p13 }
  0x20   : > { %p2574_p8 = pnand %p2573_p6, %p2567_p0 }
  0x22   : > { %2577 = shalt.err (!%p2574_p8)
}
  0x23   : > { %s2714_s20 = smov 128   ;;  %s2715_s21 = smov 8  }
  0x24   : > { %2512 = dma.hbm_to_vmem [thread:$0]  (!%p2813_p5), %s3438_s5, 2048, %s2805_s29, [#allocation5], %s2714_s20, %s2714_s20, %s2715_s21  }
  0x25   : > { %s2578_s16 = scalar_lea.hbm %s3442_s9, 2048 }
  0x26   : > { %p2579_p9 = scmp.ne.s32.totalorder %s3442_s9, %s2578_s16  ;;  %p2585_p12 = scmp.lt.u32.totalorder %s2578_s16, %s3442_s9 }
  0x28   : > { %p2581_p10 = pnand %p2579_p9, %p2829_p7 }
  0x2a   : > { %p2582_p11 = pneg %p2581_p10 }
  0x2c   : > { %p2587_p13 = pnand %p2585_p12, %p2582_p11 }
  0x2e   : > { %2590 = shalt.err (!%p2587_p13)
}
  0x2f   : > { %s2591_s29 = scalar_lea.vmem %s2809_s14, 2048  ;;  %p2599_p6 = scmp.lt.s32.totalorder %s2809_s14, %s2809_s14 }
  0x30   : > { %p2592_p0 = scmp.ne.s32.totalorder %s2809_s14, %s2591_s29  ;;  %p2600_p8 = scmp.lt.s32.totalorder %s2591_s29, %s2591_s29 }
  0x32   : > { %p2594_p1 = pnand %p2592_p0, %p2829_p7  ;;  %p2601_p9 = por %p2600_p8, %p2599_p6 }
  0x34   : > { %p2595_p4 = pneg %p2594_p1 }
  0x36   : > { %p2602_p10 = pnand %p2601_p9, %p2595_p4 }
  0x38   : > { %2605 = shalt.err (!%p2602_p10)
}
  0x39   : > { %2518 = dma.hbm_to_vmem [thread:$0]  (!%p2813_p5), %s3442_s9, 2048, %s2809_s14, [#allocation8], %s2714_s20, %s2714_s20, %s2715_s21  }
  0x3a   : > { %s2606_s23 = scalar_lea.hbm %s3436_s3, 2048 }
  0x3b   : > { %p2607_p11 = scmp.ne.s32.totalorder %s3436_s3, %s2606_s23  ;;  %p2613_p0 = scmp.lt.u32.totalorder %s2606_s23, %s3436_s3 }
  0x3d   : > { %p2609_p12 = pnand %p2607_p11, %p2829_p7 }
  0x3f   : > { %p2610_p13 = pneg %p2609_p12 }
  0x41   : > { %p2615_p1 = pnand %p2613_p0, %p2610_p13 }
  0x43   : > { %2618 = shalt.err (!%p2615_p1)
}
  0x44   : > { %s2619_s14 = scalar_lea.vmem %s2817_s17, 2048  ;;  %p2627_p9 = scmp.lt.s32.totalorder %s2817_s17, %s2817_s17 }
  0x45   : > { %p2620_p4 = scmp.ne.s32.totalorder %s2817_s17, %s2619_s14  ;;  %p2628_p10 = scmp.lt.s32.totalorder %s2619_s14, %s2619_s14 }
  0x47   : > { %p2622_p6 = pnand %p2620_p4, %p2829_p7  ;;  %p2629_p11 = por %p2628_p10, %p2627_p9 }
  0x49   : > { %p2623_p8 = pneg %p2622_p6 }
  0x4b   : > { %p2630_p12 = pnand %p2629_p11, %p2623_p8 }
  0x4d   : > { %2633 = shalt.err (!%p2630_p12)
}
  0x4e   : > { %2509 = dma.hbm_to_vmem [thread:$0]  (!%p2813_p5), %s3436_s3, 2048, %s2817_s17, [#allocation3], %s2714_s20, %s2714_s20, %s2715_s21  }
  0x4f   : > { %s2634_s22 = scalar_lea.hbm %s3440_s7, 2048 }
  0x50   : > { %p2635_p13 = scmp.ne.s32.totalorder %s3440_s7, %s2634_s22  ;;  %p2641_p4 = scmp.lt.u32.totalorder %s2634_s22, %s3440_s7 }
  0x52   : > { %p2637_p0 = pnand %p2635_p13, %p2829_p7 }
  0x54   : > { %p2638_p1 = pneg %p2637_p0 }
  0x56   : > { %p2643_p6 = pnand %p2641_p4, %p2638_p1 }
  0x58   : > { %2646 = shalt.err (!%p2643_p6)
}
  0x59   : > { %s2647_s18 = scalar_lea.vmem %s386_s19, 2048  ;;  %p2655_p11 = scmp.lt.s32.totalorder %s386_s19, %s386_s19 }
  0x5a   : > { %p2648_p8 = scmp.ne.s32.totalorder %s386_s19, %s2647_s18  ;;  %p2656_p12 = scmp.lt.s32.totalorder %s2647_s18, %s2647_s18 }
  0x5c   : > { %p2650_p9 = pnand %p2648_p8, %p2829_p7  ;;  %p2657_p2 = por %p2656_p12, %p2655_p11 }
  0x5e   : > { %p2651_p10 = pneg %p2650_p9 }
  0x60   : > { %p2658_p3 = pnand %p2657_p2, %p2651_p10 }
  0x62   : > { %2661 = shalt.err (!%p2658_p3)
}
  0x63   : > { %2515 = dma.hbm_to_vmem [thread:$0]  (!%p2813_p5), %s3440_s7, 2048, %s386_s19, [#allocation5], %s2714_s20, %s2714_s20, %s2715_s21  }
  0x64   : > { %s2716_s29 = smov [#allocation9]   ;;  %s2662_s22 = scalar_lea.hbm %s3444_s11, 2048 }
  0x65   : > { %s417_s12 = sshll.u32 %s2716_s29, 4  ;;  %p2663_p2 = scmp.ne.s32.totalorder %s3444_s11, %s2662_s22  ;;  %s418_s12 = int_to_ptr.vmem [resolvable:$true] %s417_s12 }
  0x66   : > { %p2669_p0 = scmp.lt.u32.totalorder %s2662_s22, %s3444_s11 }
  0x67   : > { %p2665_p3 = pnand %p2663_p2, %p2829_p7 }
  0x69   : > { %p2666_p13 = pneg %p2665_p3 }
  0x6b   : > { %p2671_p1 = pnand %p2669_p0, %p2666_p13 }
  0x6d   : > { %2674 = shalt.err (!%p2671_p1)
}
  0x6e   : > { %s2675_s19 = scalar_lea.vmem %s418_s12, 2048  ;;  %p2683_p9 = scmp.lt.s32.totalorder %s418_s12, %s418_s12 }
  0x6f   : > { %p2676_p4 = scmp.ne.s32.totalorder %s418_s12, %s2675_s19  ;;  %p2684_p10 = scmp.lt.s32.totalorder %s2675_s19, %s2675_s19 }
  0x71   : > { %p2678_p6 = pnand %p2676_p4, %p2829_p7  ;;  %p2685_p11 = por %p2684_p10, %p2683_p9 }
  0x73   : > { %p2679_p8 = pneg %p2678_p6 }
  0x75   : > { %p2686_p12 = pnand %p2685_p11, %p2679_p8 }
  0x77   : > { %2689 = shalt.err (!%p2686_p12)
}
  0x78   : > { %2521 = dma.hbm_to_vmem [thread:$0]  (!%p2813_p5), %s3444_s11, 2048, %s418_s12, [#allocation8], %s2714_s20, %s2714_s20, %s2715_s21  }
  0x79   : > { %p3456_p2 = scmp.ne.s32.totalorder %s3453_s27, 0 }
  0x7a   : > { %p3457_p7 = scmp.eq.s32.totalorder (!%p3456_p2), %s2796_s26, 0 }
  0x7b   : > { %444 = sbr.rel (%p3456_p2) target bundleno = 1857 (0x741), region = 72 }
  0x82   : > { %2695 = dma.done.wait (%p3457_p7), [#allocation3], 2048   ;;  %p3458_p3 = pmov %p3457_p7 }
  0x84   : > { %2697 = vsyncadd (%p3458_p3), [#allocation3], 4294965248  ;;  %p3459_p13 = pmov %p3458_p3 }
  0x85   : > { %p3460_p0 = pmov %p3458_p3 }
  0x86   : > { %2699 = dma.done.wait (%p3459_p13), [#allocation5], 4096  }
  0x87   : > { %2701 = vsyncadd (%p3460_p0), [#allocation5], 4294963200  ;;  %p3461_p1 = pmov %p3460_p0 }
  0x88   : > { %p3462_p5 = pmov %p3460_p0 }
  0x89   : > { %2703 = dma.done.wait (%p3461_p1), [#allocation8], 4096  }
  0x8a   : > { %2705 = vsyncadd (%p3462_p5), [#allocation8], 4294963200  ;;  %p504_p4 = scmp.lt.s32.totalorder %s2796_s26, 1  ;;  %v531_v0 = vlaneseq  ;;  %vm522_vm0 = vcmask 261120   ;;  %v662_v17 = vld [vmem:[%s3434_s1] sm:$0xff]  ;;  %v663_v18 = vld [vmem:[%s3434_s1 + $0x8] sm:$0xff] }
  0x8b   : > { %s2717_s13 = smov 32   ;;  %v664_v25 = vld [vmem:[%s3434_s1 + $0x10] sm:$0xff]  ;;  %v665_v26 = vld [vmem:[%s3434_s1 + $0x18] sm:$0xff]  ;;  %v2294_v29 = vpack.c.bf16 %v663_v18, %v662_v17  ;;  %s2718_s30 = smov 64   ;;  %v666_v35 = vld [vmem:[%s3434_s1 + $0x20] sm:$0xff] }
  0x8c   : > { %s3467_s26 = smov (!%p504_p4, %s2796_s26), 1  ;;  %v2972_v1 = vshrl.u32 %v531_v0, 7  ;;  %v2298_v34 = vpack.c.bf16 %v665_v26, %v664_v25  ;;  %v667_v36 = vld [vmem:[%s3434_s1 + $0x28] sm:$0xff]  ;;  %v668_v48 = vld [vmem:[%s3434_s1 + $0x30] sm:$0xff]  ;;  %v669_v49 = vld [vmem:[%s3434_s1 + $0x38] sm:$0xff]  ;;  %s3463_s15 = sld [smem:[#allocation14_spill]] }
  0x8d   : > { %s1884_s27 = sshll.u32 %s3467_s26, 6  ;;  %2295 = vmatprep.subr.bf16.mxu0 %v2294_v29  ;;  %v2302_v42 = vpack.c.bf16 %v667_v36, %v666_v35  ;;  %v2306_v59 = vpack.c.bf16 %v669_v49, %v668_v48  ;;  %v670_v63 = vld [vmem:[%s3434_s1 + $0x40] sm:$0xff]  ;;  %v671_v0 = vld [vmem:[%s3434_s1 + $0x48] sm:$0xff]  ;;  %v805_v36 = vld [vmem:[#allocation2 + $0x38] sm:$0xff]  ;;  %s3464_s21 = sld [smem:[#allocation15_spill]] }
  0x8e   : > { %s508_s20 = scalar_lea.vmem %s3433_s0, %s1884_s27  ;;  %vm597_vm1 = vcmp.lt.s32.totalorder %v2972_v1, 7  ;;  %2297 = vmatpush3.bf16.msra.mxu0 %v2294_v29  ;;  %vm564_vm2 = vcmp.lt.s32.totalorder %v2972_v1, 1  ;;  %v798_v17 = vld [vmem:[#allocation2] sm:$0xff]  ;;  %v799_v18 = vld [vmem:[#allocation2 + $0x8] sm:$0xff]  ;;  %vm548_vm4 = vcmp.ge.s32.totalorder %v2972_v1, 1  ;;  %vm999_vm5 = vcmp.lt.s32.totalorder %v2972_v1, 5 }
  0x8f   : > { %v517_v2 = vld [vmem:[%s508_s20 + $0x18] sm:$0xff]  ;;  %v514_v3 = vld [vmem:[%s508_s20] sm:$0xff]  ;;  %v515_v4 = vld [vmem:[%s508_s20 + $0x8] sm:$0xff]  ;;  %2299 = vmatprep.subr.bf16.mxu0 %v2298_v34  ;;  %vm966_vm6 = vcmp.lt.s32.totalorder %v2972_v1, 3  ;;  %vm950_vm8 = vcmp.ge.s32.totalorder %v2972_v1, 3 }
  0x90   : > { %v2975_v5 = vsel %vm522_vm0, %v517_v2, 0.0  ;;  %v2978_v6 = vsel %vm522_vm0, %v514_v3, 0.0  ;;  %v2981_v7 = vsel %vm522_vm0, %v515_v4, 0.0  ;;  %v516_v8 = vld [vmem:[%s508_s20 + $0x10] sm:$0xff]  ;;  %v518_v9 = vld [vmem:[%s508_s20 + $0x20] sm:$0xff]  ;;  %v521_v16 = vld [vmem:[%s508_s20 + $0x38] sm:$0xff]  ;;  %v2310_v4 = vpack.c.bf16 %v671_v0, %v670_v63 }
  0x91   : > { %v2984_v10 = vmax.f32 %v2975_v5, 0.0  ;;  %v2987_v11 = vmax.f32 %v2978_v6, 0.0  ;;  %v541_v12 = vmax.f32 %v2981_v7, 0.0  ;;  %v2991_v13 = vsel %vm522_vm0, %v516_v8, 0.0  ;;  %v519_v22 = vld [vmem:[%s508_s20 + $0x28] sm:$0xff]  ;;  %v520_v23 = vld [vmem:[%s508_s20 + $0x30] sm:$0xff] }
  0x92   : > { %v542_v14 = vmax.f32 %v2991_v13, 0.0  ;;  %v2996_v15 = vsel %vm522_vm0, %v518_v9, 0.0  ;;  %v3023_v28 = vsel %vm522_vm0, %v521_v16, 0.0  ;;  %v3026_v30 = vsel %vm522_vm0, %v519_v22, 0.0  ;;  %2301 = vmatpush3.bf16.msra.mxu0 %v2298_v34  ;;  %v672_v8 = vld [vmem:[%s3434_s1 + $0x50] sm:$0xff]  ;;  %v673_v9 = vld [vmem:[%s3434_s1 + $0x58] sm:$0xff] }
  0x93   : > { %620 = vrot.lane.b32.xlu1 %v2984_v10, %s2717_s13  ;;  %614 = vrot.lane.b32.xlu0 %v2987_v11, %s2717_s13  ;;  %v589_v19 = vrot.slane %v2987_v11, 1  ;;  %v590_v20 = vrot.slane %v541_v12, 1  ;;  %v3010_v21 = vmax.f32 %v2996_v15, 0.0  ;;  %v3029_v31 = vsel %vm522_vm0, %v520_v23, 0.0  ;;  %v674_v22 = vld [vmem:[%s3434_s1 + $0x60] sm:$0xff]  ;;  %v675_v25 = vld [vmem:[%s3434_s1 + $0x68] sm:$0xff]  ;;  %s513_s14 = scalar_lea.vmem %s3464_s21, %s1884_s27 }
  0x94   : > { %v591_v24 = vrot.slane %v542_v14, 1  ;;  %v592_v32 = vrot.slane %v2984_v10, 1  ;;  %v3044_v38 = vmax.f32 %v3023_v28, 0.0  ;;  %v545_v39 = vmax.f32 %v3026_v30, 0.0  ;;  %2303 = vmatprep.subr.bf16.mxu0 %v2302_v42  ;;  %v803_v29 = vld [vmem:[#allocation2 + $0x28] sm:$0xff]  ;;  %v676_v34 = vld [vmem:[%s3434_s1 + $0x70] sm:$0xff] }
  0x95   : > { %v604_v27 = vsel %vm597_vm1, %v589_v19, %v590_v20  ;;  %v593_v33 = vrot.slane %v3010_v21, 1  ;;  %v3048_v40 = vmax.f32 %v3029_v31, 0.0  ;;  %v558_v41 = vrot.slane %v542_v14, 7  ;;  %v811_v48 = vld [vmem:[#allocation2 + $0x68] sm:$0xff] }
  0x96   : > { %v603_v37 = vsel %vm597_vm1, %v590_v20, %v591_v24  ;;  %v559_v43 = vrot.slane %v2984_v10, 7  ;;  %v563_v44 = vrot.slane %v3044_v38, 7  ;;  %v556_v45 = vrot.slane %v2987_v11, 7  ;;  %2305 = vmatpush3.bf16.msra.mxu0 %v2302_v42  ;;  %v800_v20 = vld [vmem:[#allocation2 + $0x10] sm:$0xff]  ;;  %v677_v11 = vld [vmem:[%s3434_s1 + $0x78] sm:$0xff] }
  0x97   : > { %616 = vrot.lane.b32.xlu0 %v541_v12, %s2717_s13  ;;  %638 = vrot.lane.b32.xlu1 %v604_v27, %s2718_s30  ;;  %v602_v46 = vsel %vm597_vm1, %v591_v24, %v592_v32  ;;  %v601_v47 = vsel %vm597_vm1, %v592_v32, %v593_v33  ;;  %v557_v50 = vrot.slane %v541_v12, 7  ;;  %v560_v51 = vrot.slane %v3010_v21, 7  ;;  %v801_v24 = vld [vmem:[#allocation2 + $0x18] sm:$0xff]  ;;  %v802_v27 = vld [vmem:[#allocation2 + $0x20] sm:$0xff] }
  0x98   : > { %v3069_v52 = vsel %vm564_vm2, %v558_v41, %v559_v43  ;;  %v3073_v53 = vsel %vm564_vm2, %v563_v44, %v556_v45  ;;  %v561_v54 = vrot.slane %v545_v39, 7  ;;  %v562_v55 = vrot.slane %v3048_v40, 7  ;;  %2307 = vmatprep.subr.bf16.mxu0 %v2306_v59 }
  0x99   : > { %v3078_v56 = vsel %vm564_vm2, %v556_v45, %v557_v50  ;;  %v3082_v57 = vsel %vm564_vm2, %v557_v50, %v558_v41  ;;  %v3086_v58 = vsel %vm564_vm2, %v559_v43, %v560_v51  ;;  %v594_v2 = vrot.slane %v545_v39, 1  ;;  %v809_v45 = vld [vmem:[#allocation2 + $0x58] sm:$0xff] }
  0x9a   : > { %v3090_v60 = vsel %vm564_vm2, %v560_v51, %v561_v54  ;;  %v3094_v61 = vsel %vm564_vm2, %v561_v54, %v562_v55  ;;  %v3098_v62 = vsel %vm564_vm2, %v562_v55, %v563_v44  ;;  %v595_v3 = vrot.slane %v3048_v40, 1  ;;  %2309 = vmatpush3.bf16.msra.mxu0 %v2306_v59  ;;  %v808_v44 = vld [vmem:[#allocation2 + $0x50] sm:$0xff] }
  0x9b   : > { %618 = vrot.lane.b32.xlu0 %v542_v14, %s2717_s13  ;;  %640 = vrot.lane.b32.xlu1 %v603_v37, %s2718_s30  ;;  %v600_v10 = vsel %vm597_vm1, %v593_v33, %v594_v2  ;;  %v596_v14 = vrot.slane %v3044_v38, 1  ;;  %v3124_v16 = vadd.s32 56, %v2972_v1  ;;  %v2326_v23 = vpack.c.bf16 %v799_v18, %v798_v17 }
  0x9c   : > { %v599_v12 = vsel %vm597_vm1, %v594_v2, %v595_v3  ;;  %2311 = vmatprep.subr.bf16.mxu0 %v2310_v4  ;;  %v2330_v26 = vpack.c.bf16 %v801_v24, %v800_v20  ;;  %v2318_v33 = vpack.c.bf16 %v675_v25, %v674_v22  ;;  %v2334_v35 = vpack.c.bf16 %v803_v29, %v802_v27 }
  0x9d   : > { %2327 = vmatprep.subr.bf16.mxu1 %v2326_v23  ;;  %vm588_vm3 = vcmp.lt.s32.totalorder %v3124_v16, 63  ;;  %v605_v32 = vsel %vm597_vm1, %v596_v14, %v589_v19  ;;  %v804_v19 = vld [vmem:[#allocation2 + $0x30] sm:$0xff]  ;;  %v598_v37 = vsel %vm597_vm1, %v595_v3, %v596_v14  ;;  %v2322_v41 = vpack.c.bf16 %v677_v11, %v676_v34  ;;  %v1876_v11 = vld [vmem:[%s3435_s2] ss:$0 sm:$0xff] }
  0x9e   : > { %2313 = vmatpush3.bf16.msra.mxu0 %v2310_v4  ;;  %2329 = vmatpush3.bf16.msra.mxu1 %v2326_v23  ;;  %v2338_v42 = vpack.c.bf16 %v805_v36, %v804_v19  ;;  %v573_v54 = vsel %vm548_vm4, %v3073_v53, 0.0  ;;  %vm990_vm7 = vcmp.lt.s32.totalorder %v3124_v16, 61 }
  0x9f   : > { %642 = vrot.lane.b32.xlu0 %v602_v46, %s2718_s30  ;;  %644 = vrot.lane.b32.xlu1 %v601_v47, %s2718_s30  ;;  %v2346_v46 = vpack.c.bf16 %v809_v45, %v808_v44  ;;  %v810_v47 = vld [vmem:[#allocation2 + $0x60] sm:$0xff] }
  0xa0   : > { %2331 = vmatprep.subr.bf16.mxu1 %v2330_v26  ;;  %v2350_v49 = vpack.c.bf16 %v811_v48, %v810_v47 }
  0xa2   : > { %2333 = vmatpush3.bf16.msra.mxu1 %v2330_v26 }
  0xa3   : > { %622 = vrot.lane.b32.xlu0 %v3010_v21, %s2717_s13  ;;  %624 = vrot.lane.b32.xlu1 %v545_v39, %s2717_s13  ;;  %v2314_v21 = vpack.c.bf16 %v673_v9, %v672_v8  ;;  %v613_v39 = vsel %vm588_vm3, %v605_v32, 0.0 }
  0xa4   : > { %2335 = vmatprep.subr.bf16.mxu1 %v2334_v35 }
  0xa5   : > { %2315 = vmatprep.subr.bf16.mxu0 %v2314_v21 }
  0xa6   : > { %2317 = vmatpush3.bf16.msra.mxu0 %v2314_v21  ;;  %2337 = vmatpush3.bf16.msra.mxu1 %v2334_v35 }
  0xa7   : > { %646 = vrot.lane.b32.xlu0 %v600_v10, %s2718_s30  ;;  %648 = vrot.lane.b32.xlu1 %v599_v12, %s2718_s30 }
  0xa8   : > { %2319 = vmatprep.subr.bf16.mxu0 %v2318_v33  ;;  %2339 = vmatprep.subr.bf16.mxu1 %v2338_v42 }
  0xaa   : > { %2321 = vmatpush3.bf16.msra.mxu0 %v2318_v33  ;;  %2341 = vmatpush3.bf16.msra.mxu1 %v2338_v42 }
  0xab   : > { %626 = vrot.lane.b32.xlu0 %v3048_v40, %s2717_s13  ;;  %628 = vrot.lane.b32.xlu1 %v3044_v38, %s2717_s13  ;;  %v806_v38 = vld [vmem:[#allocation2 + $0x40] sm:$0xff]  ;;  %v807_v40 = vld [vmem:[#allocation2 + $0x48] sm:$0xff] }
  0xac   : > { %2323 = vmatprep.subr.bf16.mxu0 %v2322_v41  ;;  %v2342_v43 = vpack.c.bf16 %v807_v40, %v806_v38 }
  0xae   : > { %2325 = vmatpush3.bf16.msra.mxu0 %v2322_v41  ;;  %2343 = vmatprep.subr.bf16.mxu1 %v2342_v43 }
  0xaf   : > { %650 = vrot.lane.b32.xlu0 %v598_v37, %s2718_s30  ;;  %652 = vrot.lane.b32.xlu1 %v613_v39, %s2718_s30 }
  0xb0   : > { %2345 = vmatpush3.bf16.msra.mxu1 %v2342_v43 }
  0xb1   : > { %2347 = vmatprep.subr.bf16.mxu1 %v2346_v46 }
  0xb4   : > { %2349 = vmatpush3.bf16.msra.mxu1 %v2346_v46 }
  0xb5   : > { %2351 = vmatprep.subr.bf16.mxu1 %v2350_v49 }
  0xb8   : > { %2353 = vmatpush3.bf16.msra.mxu1 %v2350_v49 }
 0x105   : > { %v621_v50 = vpop.permute.xlu1 %620  ;;  %v615_v51 = vpop.permute.xlu0 %614 }
 0x106   : > { %v630_v55 = vadd.f32 %v615_v51, %v573_v54  ;;  %v633_v9 = vadd.f32 %v621_v50, %v3069_v52 }
 0x109   : > { %v617_v59 = vpop.permute.xlu0 %616  ;;  %v639_v63 = vpop.permute.xlu1 %638 }
 0x10a   : > { %v654_v0 = vadd.f32 %v639_v63, %v630_v55  ;;  %v631_v2 = vadd.f32 %v617_v59, %v3078_v56 }
 0x10c   : > { %2062 = vmatprep.mubr.f32.mxu0 %v654_v0 }
 0x10d   : > { %v619_v3 = vpop.permute.xlu0 %618  ;;  %v641_v4 = vpop.permute.xlu1 %640 }
 0x10e   : > { %v655_v8 = vadd.f32 %v641_v4, %v631_v2  ;;  %v632_v10 = vadd.f32 %v619_v3, %v3082_v57  ;;  %v1064_v2 = vld [vmem:[#allocation4] sm:$0xff]  ;;  %v1065_v3 = vld [vmem:[#allocation4 + $0x8] sm:$0xff]  ;;  %v1066_v4 = vld [vmem:[#allocation4 + $0x10] sm:$0xff] }
 0x110   : > { %2063 = vmatmul.mubr.f32.vlgmr.msra.gmra.mrb[0].mxu0 %v655_v8  ;;  %v2358_v8 = vpack.c.bf16 %v1065_v3, %v1064_v2 }
 0x111   : > { %v643_v12 = vpop.permute.xlu0 %642  ;;  %v645_v14 = vpop.permute.xlu1 %644 }
 0x112   : > { %v656_v17 = vadd.f32 %v643_v12, %v632_v10  ;;  %v657_v18 = vadd.f32 %v645_v14, %v633_v9  ;;  %v1067_v9 = vld [vmem:[#allocation4 + $0x18] sm:$0xff]  ;;  %v1068_v12 = vld [vmem:[#allocation4 + $0x20] sm:$0xff]  ;;  %v1069_v14 = vld [vmem:[#allocation4 + $0x28] sm:$0xff]  ;;  %2359 = vmatprep.subr.bf16.mxu0 %v2358_v8 }
 0x113   : > { %v2362_v10 = vpack.c.bf16 %v1067_v9, %v1066_v4  ;;  %2361 = vmatpush3.bf16.msra.mxu0 %v2358_v8 }
 0x114   : > { %2065 = vmatprep.mubr.f32.mxu0 %v656_v17  ;;  %v2366_v17 = vpack.c.bf16 %v1069_v14, %v1068_v12 }
 0x115   : > { %v623_v53 = vpop.permute.xlu0 %622  ;;  %v625_v20 = vpop.permute.xlu1 %624  ;;  %2066 = vmatmul.mubr.f32.gmra.mrb[2].mxu0 %v657_v18  ;;  %2363 = vmatprep.subr.bf16.mxu0 %v2362_v10  ;;  %v1070_v18 = vld [vmem:[#allocation4 + $0x30] sm:$0xff] }
 0x116   : > { %v635_v21 = vadd.f32 %v625_v20, %v3090_v60  ;;  %v634_v56 = vadd.f32 %v623_v53, %v3086_v58  ;;  %v812_v60 = vld [vmem:[#allocation2 + $0x70] sm:$0xff]  ;;  %v813_v58 = vld [vmem:[#allocation2 + $0x78] sm:$0xff] }
 0x117   : > { %v2354_v35 = vpack.c.bf16 %v813_v58, %v812_v60  ;;  %v1071_v53 = vld [vmem:[#allocation4 + $0x38] sm:$0xff]  ;;  %2365 = vmatpush3.bf16.msra.mxu0 %v2362_v10 }
 0x118   : > { %2367 = vmatprep.subr.bf16.mxu0 %v2366_v17  ;;  %v2370_v20 = vpack.c.bf16 %v1071_v53, %v1070_v18 }
 0x119   : > { %v647_v22 = vpop.permute.xlu0 %646  ;;  %v649_v23 = vpop.permute.xlu1 %648  ;;  %2355 = vmatprep.subr.bf16.mxu1 %v2354_v35 }
 0x11a   : > { %v658_v24 = vadd.f32 %v647_v22, %v634_v56  ;;  %v659_v25 = vadd.f32 %v649_v23, %v635_v21  ;;  %2357 = vmatpush3.bf16.msra.mxu1 %v2354_v35  ;;  %v1072_v21 = vld [vmem:[#allocation4 + $0x40] sm:$0xff]  ;;  %v1073_v56 = vld [vmem:[#allocation4 + $0x48] sm:$0xff]  ;;  %v1074_v23 = vld [vmem:[#allocation4 + $0x50] sm:$0xff] }
 0x11b   : > { %2369 = vmatpush3.bf16.msra.mxu0 %v2366_v17  ;;  %v2374_v22 = vpack.c.bf16 %v1073_v56, %v1072_v21 }
 0x11c   : > { %2068 = vmatprep.mubr.f32.mxu0 %v658_v24  ;;  %2371 = vmatprep.subr.bf16.mxu0 %v2370_v20  ;;  %v1075_v24 = vld [vmem:[#allocation4 + $0x58] sm:$0xff] }
 0x11d   : > { %v627_v52 = vpop.permute.xlu0 %626  ;;  %v629_v57 = vpop.permute.xlu1 %628  ;;  %2069 = vmatmul.mubr.f32.gmra.mrb[4].mxu0 %v659_v25  ;;  %v2378_v25 = vpack.c.bf16 %v1075_v24, %v1074_v23  ;;  %v1200_v23 = vld [vmem:[#allocation6] sm:$0xff]  ;;  %v1201_v24 = vld [vmem:[#allocation6 + $0x8] sm:$0xff] }
 0x11e   : > { %v637_v26 = vadd.f32 %v629_v57, %v3098_v62  ;;  %v636_v27 = vadd.f32 %v627_v52, %v3094_v61  ;;  %v1076_v52 = vld [vmem:[#allocation4 + $0x60] sm:$0xff]  ;;  %v1077_v57 = vld [vmem:[#allocation4 + $0x68] sm:$0xff] }
 0x11f   : > { %2373 = vmatpush3.bf16.msra.mxu0 %v2370_v20 }
 0x120   : > { %2375 = vmatprep.subr.bf16.mxu0 %v2374_v22 }
 0x121   : > { %v651_v29 = vpop.permute.xlu0 %650  ;;  %v653_v32 = vpop.permute.xlu1 %652 }
 0x122   : > { %v660_v33 = vadd.f32 %v651_v29, %v636_v27  ;;  %v661_v34 = vadd.f32 %v653_v32, %v637_v26  ;;  %v2382_v26 = vpack.c.bf16 %v1077_v57, %v1076_v52  ;;  %v1078_v27 = vld [vmem:[#allocation4 + $0x70] sm:$0xff]  ;;  %v1079_v29 = vld [vmem:[#allocation4 + $0x78] sm:$0xff] }
 0x123   : > { %2377 = vmatpush3.bf16.msra.mxu0 %v2374_v22  ;;  %v2386_v32 = vpack.c.bf16 %v1079_v29, %v1078_v27  ;;  %v1203_v27 = vld [vmem:[#allocation6 + $0x18] sm:$0xff] }
 0x124   : > { %2071 = vmatprep.mubr.f32.mxu0 %v660_v33  ;;  %2379 = vmatprep.subr.bf16.mxu0 %v2378_v25 }
 0x125   : > { %2072 = vmatmul.mubr.f32.gmra.mrb[6].mxu0 %v661_v34  ;;  %v3168_v34 = vld [vmem:[%s3437_s4] ss:$0 sm:$0xff] }
 0x127   : > { %2381 = vmatpush3.bf16.msra.mxu0 %v2378_v25  ;;  %v1202_v25 = vld [vmem:[#allocation6 + $0x10] sm:$0xff] }
 0x128   : > { %2383 = vmatprep.subr.bf16.mxu0 %v2382_v26 }
 0x12b   : > { %2385 = vmatpush3.bf16.msra.mxu0 %v2382_v26  ;;  %v2390_v26 = vpack.c.bf16 %v1201_v24, %v1200_v23 }
 0x12c   : > { %2387 = vmatprep.subr.bf16.mxu0 %v2386_v32 }
 0x12d   : > { %2391 = vmatprep.subr.bf16.mxu1 %v2390_v26 }
 0x12f   : > { %2389 = vmatpush3.bf16.msra.mxu0 %v2386_v32 }
 0x1e3   : > { %v2064_v19 = vpop.f32.mrb[0].mxu0 }
 0x1e4   : > { %v757_v36 = vadd.f32 %v2064_v19, %v1876_v11  ;;  %v751_v62 = vpop.f32.mrb[1].mxu0 }
 0x1e5   : > { %v752_v37 = vadd.f32 %v1876_v11, %v751_v62 }
 0x1e6   : > { %v791_v39 = vmax.f32 %v757_v36, 0.0 }
 0x1e7   : > { %v790_v61 = vmax.f32 %v752_v37, 0.0 }
 0x1e8   : > { %v2067_v41 = vpop.f32.mrb[2].mxu0 }
 0x1e9   : > { %v767_v42 = vadd.f32 %v2067_v41, %v1876_v11  ;;  %v761_v38 = vpop.f32.mrb[3].mxu0  ;;  %2106 = vmatprep.mubr.f32.mxu1 %v790_v61 }
 0x1ea   : > { %v762_v40 = vadd.f32 %v1876_v11, %v761_v38  ;;  %2107 = vmatmul.mubr.f32.vlgmr.msra.gmra.mrb[0].mxu1 %v791_v39 }
 0x1eb   : > { %v793_v44 = vmax.f32 %v767_v42, 0.0  ;;  %2393 = vmatpush3.bf16.msra.mxu1 %v2390_v26 }
 0x1ec   : > { %v792_v43 = vmax.f32 %v762_v40, 0.0 }
 0x1ee   : > { %2109 = vmatprep.mubr.f32.mxu1 %v792_v43 }
 0x1ef   : > { %2110 = vmatmul.mubr.f32.gmra.mrb[2].mxu1 %v793_v44 }
 0x1f0   : > { %v2070_v45 = vpop.f32.mrb[4].mxu0 }
 0x1f1   : > { %v777_v46 = vadd.f32 %v2070_v45, %v1876_v11  ;;  %v771_v47 = vpop.f32.mrb[5].mxu0 }
 0x1f2   : > { %v772_v48 = vadd.f32 %v1876_v11, %v771_v47 }
 0x1f3   : > { %v795_v50 = vmax.f32 %v777_v46, 0.0 }
 0x1f4   : > { %v794_v49 = vmax.f32 %v772_v48, 0.0 }
 0x1f6   : > { %2112 = vmatprep.mubr.f32.mxu1 %v794_v49 }
 0x1f7   : > { %2113 = vmatmul.mubr.f32.gmra.mrb[4].mxu1 %v795_v50 }
 0x1f8   : > { %v2073_v51 = vpop.f32.mrb[6].mxu0 }
 0x1f9   : > { %v787_v54 = vadd.f32 %v2073_v51, %v1876_v11  ;;  %v781_v55 = vpop.f32.mrb[7].mxu0 }
 0x1fa   : > { %v782_v59 = vadd.f32 %v1876_v11, %v781_v55 }
 0x1fb   : > { %v797_v0 = vmax.f32 %v787_v54, 0.0 }
 0x1fc   : > { %v796_v63 = vmax.f32 %v782_v59, 0.0 }
 0x1fe   : > { %2115 = vmatprep.mubr.f32.mxu1 %v796_v63 }
 0x1ff   : > { %2116 = vmatmul.mubr.f32.gmra.mrb[6].mxu1 %v797_v0 }
 0x2bd   : > { %v2108_v33 = vpop.f32.mrb[0].mxu1 }
 0x2be   : > { %v920_v60 = vadd.f32 %v2108_v33, %v2981_v7  ;;  %v880_v58 = vpop.f32.mrb[1].mxu1  ;;  %v2394_v33 = vpack.c.bf16 %v1203_v27, %v1202_v25 }
 0x2bf   : > { %v919_v35 = vadd.f32 %v880_v58, %v2978_v6 }
 0x2c0   : > { %v3173_v11 = vadd.f32 %v3168_v34, %v920_v60  ;;  %v1205_v60 = vld [vmem:[#allocation6 + $0x28] sm:$0xff]  ;;  %2395 = vmatprep.subr.bf16.mxu1 %v2394_v33 }
 0x2c1   : > { %v3176_v19 = vadd.f32 %v3168_v34, %v919_v35  ;;  %2397 = vmatpush3.bf16.msra.mxu1 %v2394_v33 }
 0x2c2   : > { %v2111_v36 = vpop.f32.mrb[2].mxu1  ;;  %v943_v62 = vmax.f32 %v3173_v11, 0.0 }
 0x2c3   : > { %v922_v37 = vadd.f32 %v2111_v36, %v2975_v5  ;;  %v890_v61 = vpop.f32.mrb[3].mxu1  ;;  %v3181_v39 = vmax.f32 %v3176_v19, 0.0 }
 0x2c4   : > { %v921_v6 = vadd.f32 %v890_v61, %v2991_v13  ;;  %1018 = vrot.lane.b32.xlu1 %v943_v62, %s2717_s13  ;;  %v992_v7 = vrot.slane %v943_v62, 3  ;;  %v959_v41 = vrot.slane %v943_v62, 5 }
 0x2c5   : > { %v3188_v42 = vadd.f32 %v3168_v34, %v922_v37  ;;  %1016 = vrot.lane.b32.xlu0 %v3181_v39, %s2717_s13  ;;  %v991_v5 = vrot.slane %v3181_v39, 3  ;;  %v958_v38 = vrot.slane %v3181_v39, 5  ;;  %v1208_v39 = vld [vmem:[#allocation6 + $0x40] sm:$0xff] }
 0x2c6   : > { %v3195_v40 = vadd.f32 %v3168_v34, %v921_v6 }
 0x2c7   : > { %v1006_v13 = vsel %vm999_vm5, %v991_v5, %v992_v7  ;;  %v945_v43 = vmax.f32 %v3188_v42, 0.0  ;;  %v3204_v44 = vsel %vm966_vm6, %v958_v38, %v959_v41 }
 0x2c8   : > { %v944_v45 = vmax.f32 %v3195_v40, 0.0 }
 0x2c9   : > { %1040 = vrot.lane.b32.xlu0 %v1006_v13, %s2718_s30  ;;  %1022 = vrot.lane.b32.xlu1 %v945_v43, %s2717_s13  ;;  %v961_v46 = vrot.slane %v945_v43, 5  ;;  %v994_v59 = vrot.slane %v945_v43, 3 }
 0x2ca   : > { %v2114_v47 = vpop.f32.mrb[4].mxu1  ;;  %v993_v48 = vrot.slane %v944_v45, 3  ;;  %v960_v49 = vrot.slane %v944_v45, 5 }
 0x2cb   : > { %v924_v50 = vadd.f32 %v2114_v47, %v3026_v30  ;;  %v900_v51 = vpop.f32.mrb[5].mxu1  ;;  %v1211_v47 = vld [vmem:[#allocation6 + $0x58] sm:$0xff] }
 0x2cc   : > { %v923_v54 = vadd.f32 %v900_v51, %v2996_v15  ;;  %v1005_v55 = vsel %vm999_vm5, %v992_v7, %v993_v48  ;;  %v3215_v63 = vsel %vm966_vm6, %v960_v49, %v961_v46  ;;  %v3224_v30 = vsel %vm966_vm6, %v959_v41, %v960_v49  ;;  %v1206_v41 = vld [vmem:[#allocation6 + $0x30] sm:$0xff]  ;;  %v1212_v49 = vld [vmem:[#allocation6 + $0x60] sm:$0xff] }
 0x2cd   : > { %v3218_v0 = vadd.f32 %v3168_v34, %v924_v50  ;;  %1020 = vrot.lane.b32.xlu0 %v944_v45, %s2717_s13  ;;  %1042 = vrot.lane.b32.xlu1 %v1005_v55, %s2718_s30  ;;  %v1004_v3 = vsel %vm999_vm5, %v993_v48, %v994_v59  ;;  %v1213_v50 = vld [vmem:[#allocation6 + $0x68] sm:$0xff] }
 0x2ce   : > { %v3227_v15 = vadd.f32 %v3168_v34, %v923_v54  ;;  %v2414_v51 = vpack.c.bf16 %v1213_v50, %v1212_v49 }
 0x2cf   : > { %v947_v2 = vmax.f32 %v3218_v0, 0.0 }
 0x2d0   : > { %v946_v4 = vmax.f32 %v3227_v15, 0.0 }
 0x2d1   : > { %1044 = vrot.lane.b32.xlu0 %v1004_v3, %s2718_s30  ;;  %1026 = vrot.lane.b32.xlu1 %v947_v2, %s2717_s13  ;;  %v963_v8 = vrot.slane %v947_v2, 5  ;;  %v996_v20 = vrot.slane %v947_v2, 3 }
 0x2d2   : > { %v2117_v9 = vpop.f32.mrb[6].mxu1  ;;  %v995_v10 = vrot.slane %v946_v4, 3  ;;  %v962_v12 = vrot.slane %v946_v4, 5 }
 0x2d3   : > { %v926_v14 = vadd.f32 %v2117_v9, %v3023_v28  ;;  %v910_v17 = vpop.f32.mrb[7].mxu1 }
 0x2d4   : > { %v925_v18 = vadd.f32 %v910_v17, %v3029_v31  ;;  %v1003_v53 = vsel %vm999_vm5, %v994_v59, %v995_v10  ;;  %v3241_v21 = vsel %vm966_vm6, %v962_v12, %v963_v8  ;;  %v3250_v28 = vsel %vm966_vm6, %v961_v46, %v962_v12  ;;  %v1210_v46 = vld [vmem:[#allocation6 + $0x50] sm:$0xff] }
 0x2d5   : > { %v3244_v56 = vadd.f32 %v3168_v34, %v926_v14  ;;  %1024 = vrot.lane.b32.xlu0 %v946_v4, %s2717_s13  ;;  %1046 = vrot.lane.b32.xlu1 %v1003_v53, %s2718_s30  ;;  %v1002_v52 = vsel %vm999_vm5, %v995_v10, %v996_v20  ;;  %v2410_v48 = vpack.c.bf16 %v1211_v47, %v1210_v46 }
 0x2d6   : > { %v3253_v31 = vadd.f32 %v3168_v34, %v925_v18  ;;  %v1204_v34 = vld [vmem:[#allocation6 + $0x20] sm:$0xff] }
 0x2d7   : > { %v949_v22 = vmax.f32 %v3244_v56, 0.0  ;;  %v2398_v37 = vpack.c.bf16 %v1205_v60, %v1204_v34 }
 0x2d8   : > { %v948_v57 = vmax.f32 %v3253_v31, 0.0 }
 0x2d9   : > { %1048 = vrot.lane.b32.xlu0 %v1002_v52, %s2718_s30  ;;  %1030 = vrot.lane.b32.xlu1 %v949_v22, %s2717_s13  ;;  %v998_v29 = vrot.slane %v949_v22, 3  ;;  %v965_v32 = vrot.slane %v949_v22, 5 }
 0x2da   : > { %v997_v58 = vrot.slane %v948_v57, 3  ;;  %v964_v35 = vrot.slane %v948_v57, 5  ;;  %2399 = vmatprep.subr.bf16.mxu1 %v2398_v37 }
 0x2db   : > { %v974_v36 = vsel %vm966_vm6, %v965_v32, %v958_v38  ;;  %v1007_v61 = vsel %vm999_vm5, %v998_v29, %v991_v5  ;;  %v1207_v38 = vld [vmem:[#allocation6 + $0x38] sm:$0xff]  ;;  %v1209_v5 = vld [vmem:[#allocation6 + $0x48] sm:$0xff]  ;;  %2401 = vmatpush3.bf16.msra.mxu1 %v2398_v37 }
 0x2dc   : > { %v1001_v62 = vsel %vm999_vm5, %v996_v20, %v997_v58  ;;  %v967_v6 = vsel %vm966_vm6, %v964_v35, %v965_v32  ;;  %v968_v7 = vsel %vm966_vm6, %v963_v8, %v964_v35  ;;  %v1015_v13 = vsel %vm990_vm7, %v1007_v61, 0.0 }
 0x2dd   : > { %1028 = vrot.lane.b32.xlu0 %v948_v57, %s2717_s13  ;;  %1050 = vrot.lane.b32.xlu1 %v1001_v62, %s2718_s30  ;;  %v1000_v43 = vsel %vm999_vm5, %v997_v58, %v998_v29  ;;  %v2402_v16 = vpack.c.bf16 %v1207_v38, %v1206_v41  ;;  %v2406_v45 = vpack.c.bf16 %v1209_v5, %v1208_v39  ;;  %v975_v59 = vsel %vm950_vm8, %v974_v36, 0.0  ;;  %v1215_v36 = vld [vmem:[#allocation6 + $0x78] sm:$0xff] }
 0x2df   : > { %2403 = vmatprep.subr.bf16.mxu1 %v2402_v16 }
 0x2e0   : > { %2405 = vmatpush3.bf16.msra.mxu1 %v2402_v16 }
 0x2e1   : > { %1054 = vrot.lane.b32.xlu1 %v1015_v13, %s2718_s30  ;;  %1052 = vrot.lane.b32.xlu0 %v1000_v43, %s2718_s30 }
 0x2e2   : > { %2407 = vmatprep.subr.bf16.mxu1 %v2406_v45 }
 0x2e4   : > { %2409 = vmatpush3.bf16.msra.mxu1 %v2406_v45 }
 0x2e5   : > { %2411 = vmatprep.subr.bf16.mxu1 %v2410_v48 }
 0x2e8   : > { %2413 = vmatpush3.bf16.msra.mxu1 %v2410_v48 }
 0x2e9   : > { %2415 = vmatprep.subr.bf16.mxu1 %v2414_v51 }
 0x2ec   : > { %2417 = vmatpush3.bf16.msra.mxu1 %v2414_v51 }
 0x336   : > { %v1019_v54 = vpop.permute.xlu1 %1018 }
 0x337   : > { %v1017_v55 = vpop.permute.xlu0 %1016  ;;  %v1033_v9 = vadd.f32 %v1019_v54, %v3204_v44 }
 0x338   : > { %v1032_v2 = vadd.f32 %v1017_v55, %v975_v59 }
 0x33b   : > { %v1041_v3 = vpop.permute.xlu0 %1040  ;;  %v1023_v4 = vpop.permute.xlu1 %1022 }
 0x33c   : > { %v1056_v8 = vadd.f32 %v1041_v3, %v1032_v2  ;;  %v1035_v22 = vadd.f32 %v1023_v4, %v3215_v63 }
 0x33e   : > { %2150 = vmatprep.mubr.f32.mxu0 %v1056_v8  ;;  %v1464_v8 = vld [vmem:[#allocation7] sm:$0xff] }
 0x33f   : > { %v1021_v10 = vpop.permute.xlu0 %1020  ;;  %v1043_v12 = vpop.permute.xlu1 %1042 }
 0x340   : > { %v1057_v14 = vadd.f32 %v1043_v12, %v1033_v9  ;;  %v1034_v17 = vadd.f32 %v1021_v10, %v3224_v30  ;;  %v1465_v9 = vld [vmem:[#allocation7 + $0x8] sm:$0xff]  ;;  %v1466_v10 = vld [vmem:[#allocation7 + $0x10] sm:$0xff] }
 0x341   : > { %v2422_v12 = vpack.c.bf16 %v1465_v9, %v1464_v8 }
 0x342   : > { %2151 = vmatmul.mubr.f32.vlgmr.msra.gmra.mrb[8].mxu0 %v1057_v14  ;;  %v1467_v14 = vld [vmem:[#allocation7 + $0x18] sm:$0xff] }
 0x343   : > { %v1045_v18 = vpop.permute.xlu0 %1044  ;;  %v1027_v53 = vpop.permute.xlu1 %1026  ;;  %2423 = vmatprep.subr.bf16.mxu0 %v2422_v12 }
 0x344   : > { %v1058_v20 = vadd.f32 %v1045_v18, %v1034_v17  ;;  %v1037_v27 = vadd.f32 %v1027_v53, %v3241_v21  ;;  %v1878_v21 = vld [vmem:[%s3439_s6] ss:$0 sm:$0xff]  ;;  %v2426_v17 = vpack.c.bf16 %v1467_v14, %v1466_v10  ;;  %v1469_v53 = vld [vmem:[#allocation7 + $0x28] sm:$0xff]  ;;  %2425 = vmatpush3.bf16.msra.mxu0 %v2422_v12 }
 0x345   : > { %v1468_v18 = vld [vmem:[#allocation7 + $0x20] sm:$0xff] }
 0x346   : > { %2153 = vmatprep.mubr.f32.mxu0 %v1058_v20  ;;  %2427 = vmatprep.subr.bf16.mxu0 %v2426_v17  ;;  %v2430_v20 = vpack.c.bf16 %v1469_v53, %v1468_v18 }
 0x347   : > { %v1025_v23 = vpop.permute.xlu0 %1024  ;;  %v1047_v24 = vpop.permute.xlu1 %1046 }
 0x348   : > { %v1059_v25 = vadd.f32 %v1047_v24, %v1035_v22  ;;  %v1036_v52 = vadd.f32 %v1025_v23, %v3250_v28  ;;  %v1214_v28 = vld [vmem:[#allocation6 + $0x70] sm:$0xff]  ;;  %v1471_v23 = vld [vmem:[#allocation7 + $0x38] sm:$0xff]  ;;  %2429 = vmatpush3.bf16.msra.mxu0 %v2426_v17 }
 0x349   : > { %v2418_v62 = vpack.c.bf16 %v1215_v36, %v1214_v28  ;;  %v1470_v22 = vld [vmem:[#allocation7 + $0x30] sm:$0xff]  ;;  %2431 = vmatprep.subr.bf16.mxu0 %v2430_v20 }
 0x34a   : > { %2154 = vmatmul.mubr.f32.gmra.mrb[10].mxu0 %v1059_v25  ;;  %v2434_v24 = vpack.c.bf16 %v1471_v23, %v1470_v22  ;;  %v1472_v25 = vld [vmem:[#allocation7 + $0x40] sm:$0xff]  ;;  %v1478_v36 = vld [vmem:[#allocation7 + $0x70] sm:$0xff] }
 0x34b   : > { %v1049_v44 = vpop.permute.xlu0 %1048  ;;  %v1031_v57 = vpop.permute.xlu1 %1030  ;;  %2419 = vmatprep.subr.bf16.mxu1 %v2418_v62 }
 0x34c   : > { %v1060_v26 = vadd.f32 %v1049_v44, %v1036_v52  ;;  %v1039_v33 = vadd.f32 %v1031_v57, %v967_v6  ;;  %2421 = vmatpush3.bf16.msra.mxu1 %v2418_v62  ;;  %2433 = vmatpush3.bf16.msra.mxu0 %v2430_v20  ;;  %v1473_v52 = vld [vmem:[#allocation7 + $0x48] sm:$0xff]  ;;  %v1474_v57 = vld [vmem:[#allocation7 + $0x50] sm:$0xff]  ;;  %v1479_v62 = vld [vmem:[#allocation7 + $0x78] sm:$0xff] }
 0x34d   : > { %2435 = vmatprep.subr.bf16.mxu0 %v2434_v24  ;;  %v2438_v44 = vpack.c.bf16 %v1473_v52, %v1472_v25 }
 0x34e   : > { %2156 = vmatprep.mubr.f32.mxu0 %v1060_v26  ;;  %v1475_v26 = vld [vmem:[#allocation7 + $0x58] sm:$0xff] }
 0x34f   : > { %v1029_v30 = vpop.permute.xlu0 %1028  ;;  %v1051_v29 = vpop.permute.xlu1 %1050 }
 0x350   : > { %v1061_v32 = vadd.f32 %v1051_v29, %v1037_v27  ;;  %v1038_v34 = vadd.f32 %v1029_v30, %v968_v7  ;;  %2437 = vmatpush3.bf16.msra.mxu0 %v2434_v24  ;;  %v2442_v27 = vpack.c.bf16 %v1475_v26, %v1474_v57  ;;  %v3292_v29 = vld [vmem:[%s3441_s8] ss:$0 sm:$0xff] }
 0x351   : > { %2439 = vmatprep.subr.bf16.mxu0 %v2438_v44 }
 0x352   : > { %2157 = vmatmul.mubr.f32.gmra.mrb[12].mxu0 %v1061_v32  ;;  %v1476_v32 = vld [vmem:[#allocation7 + $0x60] sm:$0xff] }
 0x353   : > { %v1055_v63 = vpop.permute.xlu1 %1054  ;;  %v1053_v60 = vpop.permute.xlu0 %1052 }
 0x354   : > { %v1063_v58 = vadd.f32 %v1055_v63, %v1039_v33  ;;  %v1062_v35 = vadd.f32 %v1053_v60, %v1038_v34  ;;  %2441 = vmatpush3.bf16.msra.mxu0 %v2438_v44  ;;  %v1477_v33 = vld [vmem:[#allocation7 + $0x68] sm:$0xff] }
 0x355   : > { %2443 = vmatprep.subr.bf16.mxu0 %v2442_v27  ;;  %v2446_v60 = vpack.c.bf16 %v1477_v33, %v1476_v32  ;;  %v1601_v32 = vld [vmem:[#allocation9 + $0x8] sm:$0xff]  ;;  %v1602_v33 = vld [vmem:[#allocation9 + $0x10] sm:$0xff] }
 0x356   : > { %2159 = vmatprep.mubr.f32.mxu0 %v1062_v35 }
 0x357   : > { %2160 = vmatmul.mubr.f32.gmra.mrb[14].mxu0 %v1063_v58 }
 0x358   : > { %2445 = vmatpush3.bf16.msra.mxu0 %v2442_v27 }
 0x359   : > { %2447 = vmatprep.subr.bf16.mxu0 %v2446_v60 }
 0x35c   : > { %2449 = vmatpush3.bf16.msra.mxu0 %v2446_v60 }
 0x415   : > { %v2152_v37 = vpop.f32.mrb[8].mxu0 }
 0x416   : > { %v1159_v61 = vadd.f32 %v2152_v37, %v1878_v21  ;;  %v1153_v6 = vpop.f32.mrb[9].mxu0  ;;  %v2450_v37 = vpack.c.bf16 %v1479_v62, %v1478_v36  ;;  %v1604_v62 = vld [vmem:[#allocation9 + $0x20] sm:$0xff] }
 0x417   : > { %v1154_v7 = vadd.f32 %v1878_v21, %v1153_v6 }
 0x418   : > { %v1193_v38 = vmax.f32 %v1159_v61, 0.0  ;;  %2451 = vmatprep.subr.bf16.mxu0 %v2450_v37 }
 0x419   : > { %v1192_v41 = vmax.f32 %v1154_v7, 0.0  ;;  %2453 = vmatpush3.bf16.msra.mxu0 %v2450_v37 }
 0x41b   : > { %2194 = vmatprep.mubr.f32.mxu1 %v1192_v41 }
 0x41c   : > { %2195 = vmatmul.mubr.f32.vlgmr.msra.gmra.mrb[8].mxu1 %v1193_v38 }
 0x41d   : > { %v2155_v13 = vpop.f32.mrb[10].mxu0 }
 0x41e   : > { %v1169_v43 = vadd.f32 %v2155_v13, %v1878_v21  ;;  %v1163_v16 = vpop.f32.mrb[11].mxu0 }
 0x41f   : > { %v1164_v39 = vadd.f32 %v1878_v21, %v1163_v16 }
 0x420   : > { %v1195_v45 = vmax.f32 %v1169_v43, 0.0 }
 0x421   : > { %v1194_v5 = vmax.f32 %v1164_v39, 0.0 }
 0x423   : > { %2197 = vmatprep.mubr.f32.mxu1 %v1194_v5 }
 0x424   : > { %2198 = vmatmul.mubr.f32.gmra.mrb[10].mxu1 %v1195_v45 }
 0x425   : > { %v2158_v46 = vpop.f32.mrb[12].mxu0 }
 0x426   : > { %v1179_v47 = vadd.f32 %v2158_v46, %v1878_v21  ;;  %v1173_v48 = vpop.f32.mrb[13].mxu0 }
 0x427   : > { %v1174_v49 = vadd.f32 %v1878_v21, %v1173_v48 }
 0x428   : > { %v1197_v51 = vmax.f32 %v1179_v47, 0.0 }
 0x429   : > { %v1196_v50 = vmax.f32 %v1174_v49, 0.0 }
 0x42a   : > { %v2161_v54 = vpop.f32.mrb[14].mxu0 }
 0x42b   : > { %v1189_v55 = vadd.f32 %v2161_v54, %v1878_v21  ;;  %v1183_v59 = vpop.f32.mrb[15].mxu0  ;;  %2200 = vmatprep.mubr.f32.mxu1 %v1196_v50 }
 0x42c   : > { %v1184_v2 = vadd.f32 %v1878_v21, %v1183_v59  ;;  %2201 = vmatmul.mubr.f32.gmra.mrb[12].mxu1 %v1197_v51 }
 0x42d   : > { %v1199_v4 = vmax.f32 %v1189_v55, 0.0 }
 0x42e   : > { %v1198_v3 = vmax.f32 %v1184_v2, 0.0 }
 0x430   : > { %2203 = vmatprep.mubr.f32.mxu1 %v1198_v3 }
 0x431   : > { %2204 = vmatmul.mubr.f32.gmra.mrb[14].mxu1 %v1199_v4 }
 0x4ef   : > { %v2196_v30 = vpop.f32.mrb[8].mxu1 }
 0x4f0   : > { %v1322_v34 = vadd.f32 %v2196_v30, %v3173_v11  ;;  %v1282_v63 = vpop.f32.mrb[9].mxu1 }
 0x4f1   : > { %v1321_v58 = vadd.f32 %v1282_v63, %v3176_v19  ;;  %v538_v63 = vadd.s32 48, %v2972_v1 }
 0x4f2   : > { %v3297_v35 = vadd.f32 %v3292_v29, %v1322_v34  ;;  %v1603_v34 = vld [vmem:[#allocation9 + $0x18] sm:$0xff] }
 0x4f3   : > { %v3300_v28 = vadd.f32 %v3292_v29, %v1321_v58  ;;  %v2458_v36 = vpack.c.bf16 %v1603_v34, %v1602_v33  ;;  %vm1390_vm9 = vcmp.lt.s32.totalorder %v538_v63, 55 }
 0x4f4   : > { %v1345_v21 = vmax.f32 %v3297_v35, 0.0 }
 0x4f5   : > { %v3304_v61 = vmax.f32 %v3300_v28, 0.0 }
 0x4f6   : > { %1418 = vrot.lane.b32.xlu0 %v1345_v21, %s2717_s13  ;;  %v1361_v11 = vrot.slane %v1345_v21, 7  ;;  %v1393_v47 = vrot.slane %v1345_v21, 1  ;;  %v1605_v21 = vld [vmem:[#allocation9 + $0x28] sm:$0xff] }
 0x4f7   : > { %v2199_v19 = vpop.f32.mrb[10].mxu1  ;;  %1416 = vrot.lane.b32.xlu1 %v3304_v61, %s2717_s13  ;;  %v1360_v6 = vrot.slane %v3304_v61, 7 }
 0x4f8   : > { %v1324_v7 = vadd.f32 %v2199_v19, %v3188_v42  ;;  %v1292_v41 = vpop.f32.mrb[11].mxu1 }
 0x4f9   : > { %v1323_v38 = vadd.f32 %v1292_v41, %v3195_v40  ;;  %v3314_v13 = vsel %vm564_vm2, %v1360_v6, %v1361_v11  ;;  %v1606_v41 = vld [vmem:[#allocation9 + $0x30] sm:$0xff] }
 0x4fa   : > { %v3317_v43 = vadd.f32 %v3292_v29, %v1324_v7  ;;  %v2462_v7 = vpack.c.bf16 %v1605_v21, %v1604_v62 }
 0x4fb   : > { %v3320_v16 = vadd.f32 %v3292_v29, %v1323_v38  ;;  %v1607_v38 = vld [vmem:[#allocation9 + $0x38] sm:$0xff] }
 0x4fc   : > { %v1347_v39 = vmax.f32 %v3317_v43, 0.0 }
 0x4fd   : > { %v1346_v5 = vmax.f32 %v3320_v16, 0.0 }
 0x4fe   : > { %1422 = vrot.lane.b32.xlu1 %v1347_v39, %s2717_s13  ;;  %v1395_v42 = vrot.slane %v1347_v39, 1  ;;  %v1363_v45 = vrot.slane %v1347_v39, 7  ;;  %v2719_v39 = vmov 0.0  }
 0x4ff   : > { %v2202_v46 = vpop.f32.mrb[12].mxu1  ;;  %1420 = vrot.lane.b32.xlu0 %v1346_v5, %s2717_s13  ;;  %v1394_v40 = vrot.slane %v1346_v5, 1  ;;  %v1362_v48 = vrot.slane %v1346_v5, 7  ;;  %v2466_v5 = vpack.c.bf16 %v1607_v38, %v1606_v41 }
 0x500   : > { %v1326_v49 = vadd.f32 %v2202_v46, %v3218_v0  ;;  %v1302_v50 = vpop.f32.mrb[13].mxu1 }
 0x501   : > { %v1325_v51 = vadd.f32 %v1302_v50, %v3227_v15  ;;  %v1404_v54 = vsel %vm597_vm1, %v1394_v40, %v1395_v42  ;;  %v1405_v55 = vsel %vm597_vm1, %v1393_v47, %v1394_v40  ;;  %v3334_v59 = vsel %vm564_vm2, %v1361_v11, %v1362_v48  ;;  %v1610_v40 = vld [vmem:[#allocation9 + $0x50] sm:$0xff]  ;;  %v1611_v47 = vld [vmem:[#allocation9 + $0x58] sm:$0xff]  ;;  %v1613_v50 = vld [vmem:[#allocation9 + $0x68] sm:$0xff] }
 0x502   : > { %v3337_v2 = vadd.f32 %v3292_v29, %v1326_v49  ;;  %1442 = vrot.lane.b32.xlu1 %v1404_v54, %s2718_s30  ;;  %v3342_v0 = vsel %vm564_vm2, %v1362_v48, %v1363_v45  ;;  %v1392_v11 = vrot.slane %v3304_v61, 1  ;;  %v2474_v48 = vpack.c.bf16 %v1611_v47, %v1610_v40  ;;  %v1612_v49 = vld [vmem:[#allocation9 + $0x60] sm:$0xff] }
 0x503   : > { %v3345_v15 = vadd.f32 %v3292_v29, %v1325_v51  ;;  %1440 = vrot.lane.b32.xlu0 %v1405_v55, %s2718_s30  ;;  %v2478_v51 = vpack.c.bf16 %v1613_v50, %v1612_v49  ;;  %v533_v55 = vadd.s32 8, %v2972_v1 }
 0x504   : > { %v2205_v3 = vpop.f32.mrb[14].mxu1  ;;  %v1349_v4 = vmax.f32 %v3337_v2, 0.0 }
 0x505   : > { %v1328_v8 = vadd.f32 %v2205_v3, %v3244_v56  ;;  %v1312_v9 = vpop.f32.mrb[15].mxu1  ;;  %v1348_v10 = vmax.f32 %v3345_v15, 0.0  ;;  %vm1353_vm10 = vcmp.ge.s32.totalorder %v533_v55, 9 }
 0x506   : > { %v1327_v12 = vadd.f32 %v1312_v9, %v3253_v31  ;;  %1426 = vrot.lane.b32.xlu1 %v1349_v4, %s2717_s13  ;;  %v1397_v14 = vrot.slane %v1349_v4, 1  ;;  %v1365_v17 = vrot.slane %v1349_v4, 7 }
 0x507   : > { %v3354_v18 = vadd.f32 %v3292_v29, %v1328_v8  ;;  %1424 = vrot.lane.b32.xlu0 %v1348_v10, %s2717_s13  ;;  %v1396_v53 = vrot.slane %v1348_v10, 1  ;;  %v1364_v20 = vrot.slane %v1348_v10, 7 }
 0x508   : > { %v3358_v22 = vadd.f32 %v3292_v29, %v1327_v12  ;;  %v1600_v29 = vld [vmem:[#allocation9] sm:$0xff] }
 0x509   : > { %v1402_v56 = vsel %vm597_vm1, %v1396_v53, %v1397_v14  ;;  %v1403_v31 = vsel %vm597_vm1, %v1395_v42, %v1396_v53  ;;  %v1351_v23 = vmax.f32 %v3354_v18, 0.0  ;;  %v3367_v24 = vsel %vm564_vm2, %v1363_v45, %v1364_v20  ;;  %v1608_v42 = vld [vmem:[#allocation9 + $0x40] sm:$0xff]  ;;  %v1609_v45 = vld [vmem:[#allocation9 + $0x48] sm:$0xff] }
 0x50a   : > { %1446 = vrot.lane.b32.xlu1 %v1402_v56, %s2718_s30  ;;  %v1350_v25 = vmax.f32 %v3358_v22, 0.0  ;;  %v3373_v52 = vsel %vm564_vm2, %v1364_v20, %v1365_v17  ;;  %v2454_v58 = vpack.c.bf16 %v1601_v32, %v1600_v29  ;;  %v2470_v46 = vpack.c.bf16 %v1609_v45, %v1608_v42 }
 0x50b   : > { %1444 = vrot.lane.b32.xlu0 %v1403_v31, %s2718_s30  ;;  %v1367_v44 = vrot.slane %v1351_v23, 7  ;;  %v1399_v27 = vrot.slane %v1351_v23, 1 }
 0x50c   : > { %v1366_v57 = vrot.slane %v1350_v25, 7  ;;  %v1398_v26 = vrot.slane %v1350_v25, 1  ;;  %2455 = vmatprep.subr.bf16.mxu1 %v2454_v58 }
 0x50d   : > { %v1375_v30 = vsel %vm564_vm2, %v1367_v44, %v1360_v6  ;;  %2457 = vmatpush3.bf16.msra.mxu1 %v2454_v58  ;;  %v1407_v6 = vsel %vm597_vm1, %v1399_v27, %v1392_v11 }
 0x50e   : > { %1430 = vrot.lane.b32.xlu1 %v1351_v23, %s2717_s13  ;;  %v3383_v60 = vsel %vm564_vm2, %v1365_v17, %v1366_v57  ;;  %v1400_v37 = vsel %vm597_vm1, %v1398_v26, %v1399_v27  ;;  %v1401_v19 = vsel %vm597_vm1, %v1397_v14, %v1398_v26  ;;  %2459 = vmatprep.subr.bf16.mxu1 %v2458_v36  ;;  %v1414_v61 = vsel %vm1390_vm9, %v1407_v6, 0.0 }
 0x50f   : > { %1428 = vrot.lane.b32.xlu0 %v1350_v25, %s2717_s13  ;;  %v1377_v9 = vsel %vm1353_vm10, %v1375_v30, 0.0 }
 0x511   : > { %2461 = vmatpush3.bf16.msra.mxu1 %v2458_v36 }
 0x512   : > { %1450 = vrot.lane.b32.xlu1 %v1400_v37, %s2718_s30  ;;  %2463 = vmatprep.subr.bf16.mxu1 %v2462_v7  ;;  %v1614_v37 = vld [vmem:[#allocation9 + $0x70] sm:$0xff] }
 0x513   : > { %1448 = vrot.lane.b32.xlu0 %v1401_v19, %s2718_s30 }
 0x515   : > { %2465 = vmatpush3.bf16.msra.mxu1 %v2462_v7 }
 0x516   : > { %1454 = vrot.lane.b32.xlu1 %v2719_v39, %s2718_s30  ;;  %2467 = vmatprep.subr.bf16.mxu1 %v2466_v5 }
 0x517   : > { %1452 = vrot.lane.b32.xlu0 %v1414_v61, %s2718_s30 }
 0x519   : > { %2469 = vmatpush3.bf16.msra.mxu1 %v2466_v5 }
 0x51a   : > { %2471 = vmatprep.subr.bf16.mxu1 %v2470_v46 }
 0x51d   : > { %2473 = vmatpush3.bf16.msra.mxu1 %v2470_v46 }
 0x51e   : > { %2475 = vmatprep.subr.bf16.mxu1 %v2474_v48 }
 0x521   : > { %2477 = vmatpush3.bf16.msra.mxu1 %v2474_v48 }
 0x522   : > { %2479 = vmatprep.subr.bf16.mxu1 %v2478_v51 }
 0x525   : > { %2481 = vmatpush3.bf16.msra.mxu1 %v2478_v51 }
 0x568   : > { %v1419_v3 = vpop.permute.xlu0 %1418 }
 0x569   : > { %v1417_v54 = vpop.permute.xlu1 %1416  ;;  %v1433_v12 = vadd.f32 %v1419_v3, %v1377_v9 }
 0x570   : > { %v1423_v4 = vpop.permute.xlu1 %1422 }
 0x571   : > { %v1421_v8 = vpop.permute.xlu0 %1420  ;;  %v1435_v25 = vadd.f32 %v1423_v4, %v3334_v59 }
 0x572   : > { %v1434_v31 = vadd.f32 %v1421_v8, %v3314_v13 }
 0x574   : > { %v1443_v10 = vpop.permute.xlu1 %1442 }
 0x575   : > { %v1441_v14 = vpop.permute.xlu0 %1440  ;;  %v1457_v53 = vadd.f32 %v1443_v10, %v1433_v12  ;;  %v1881_v10 = vld [vmem:[%s3463_s15] ss:$0 sm:$0xff] }
 0x576   : > { %v1456_v17 = vadd.f32 %v1441_v14, %v1417_v54 }
 0x578   : > { %v1427_v20 = vpop.permute.xlu1 %1426  ;;  %2238 = vmatprep.mubr.f32.mxu0 %v1456_v17 }
 0x579   : > { %v1425_v56 = vpop.permute.xlu0 %1424  ;;  %2239 = vmatmul.mubr.f32.vlgmr.msra.gmra.mrb[16].mxu0 %v1457_v53  ;;  %v1437_v32 = vadd.f32 %v1427_v20, %v3367_v24  ;;  %v1880_v24 = vld [vmem:[%s3443_s10] ss:$0 sm:$0xff] }
 0x57a   : > { %v1436_v30 = vadd.f32 %v1425_v56, %v3342_v0  ;;  %v1615_v0 = vld [vmem:[#allocation9 + $0x78] sm:$0xff] }
 0x57b   : > { %v2482_v11 = vpack.c.bf16 %v1615_v0, %v1614_v37 }
 0x57c   : > { %v1447_v23 = vpop.permute.xlu1 %1446 }
 0x57d   : > { %v1445_v1 = vpop.permute.xlu0 %1444  ;;  %v1459_v57 = vadd.f32 %v1447_v23, %v1435_v25  ;;  %2483 = vmatprep.subr.bf16.mxu1 %v2482_v11 }
 0x57e   : > { %v1458_v44 = vadd.f32 %v1445_v1, %v1434_v31  ;;  %2485 = vmatpush3.bf16.msra.mxu1 %v2482_v11 }
 0x580   : > { %v1431_v26 = vpop.permute.xlu1 %1430  ;;  %2241 = vmatprep.mubr.f32.mxu0 %v1458_v44 }
 0x581   : > { %2242 = vmatmul.mubr.f32.gmra.mrb[18].mxu0 %v1459_v57  ;;  %v1429_v27 = vpop.permute.xlu0 %1428  ;;  %v1439_v59 = vadd.f32 %v1431_v26, %v3383_v60 }
 0x582   : > { %v1438_v13 = vadd.f32 %v1429_v27, %v3373_v52 }
 0x584   : > { %v1451_v29 = vpop.permute.xlu1 %1450 }
 0x585   : > { %v1449_v33 = vpop.permute.xlu0 %1448  ;;  %v1461_v63 = vadd.f32 %v1451_v29, %v1437_v32 }
 0x586   : > { %v1460_v34 = vadd.f32 %v1449_v33, %v1436_v30 }
 0x588   : > { %2244 = vmatprep.mubr.f32.mxu0 %v1460_v34  ;;  %v1455_v58 = vpop.permute.xlu1 %1454 }
 0x589   : > { %v1453_v36 = vpop.permute.xlu0 %1452  ;;  %2245 = vmatmul.mubr.f32.gmra.mrb[20].mxu0 %v1461_v63  ;;  %v1463_v21 = vadd.f32 %v1455_v58, %v1439_v59 }
 0x58a   : > { %v1462_v62 = vadd.f32 %v1453_v36, %v1438_v13 }
 0x58c   : > { %2247 = vmatprep.mubr.f32.mxu0 %v1462_v62 }
 0x58d   : > { %2248 = vmatmul.mubr.f32.gmra.mrb[22].mxu0 %v1463_v21 }
 0x64c   : > { %v2240_v52 = vpop.f32.mrb[16].mxu0 }
 0x64d   : > { %v1559_v19 = vadd.f32 %v2240_v52, %v1880_v24  ;;  %v1553_v6 = vpop.f32.mrb[17].mxu0 }
 0x64e   : > { %v1554_v7 = vadd.f32 %v1880_v24, %v1553_v6 }
 0x64f   : > { %v1593_v41 = vmax.f32 %v1559_v19, 0.0 }
 0x650   : > { %v1592_v60 = vmax.f32 %v1554_v7, 0.0 }
 0x652   : > { %2282 = vmatprep.mubr.f32.mxu1 %v1592_v60 }
 0x653   : > { %2283 = vmatmul.mubr.f32.vlgmr.msra.gmra.mrb[16].mxu1 %v1593_v41 }
 0x654   : > { %v2243_v38 = vpop.f32.mrb[18].mxu0 }
 0x655   : > { %v1569_v39 = vadd.f32 %v2243_v38, %v1880_v24  ;;  %v1563_v61 = vpop.f32.mrb[19].mxu0 }
 0x656   : > { %v1564_v5 = vadd.f32 %v1880_v24, %v1563_v61 }
 0x657   : > { %v1595_v45 = vmax.f32 %v1569_v39, 0.0 }
 0x658   : > { %v1594_v42 = vmax.f32 %v1564_v5, 0.0 }
 0x65a   : > { %2285 = vmatprep.mubr.f32.mxu1 %v1594_v42 }
 0x65b   : > { %2286 = vmatmul.mubr.f32.gmra.mrb[18].mxu1 %v1595_v45 }
 0x65c   : > { %v2246_v46 = vpop.f32.mrb[20].mxu0 }
 0x65d   : > { %v1579_v40 = vadd.f32 %v2246_v46, %v1880_v24  ;;  %v1573_v47 = vpop.f32.mrb[21].mxu0 }
 0x65e   : > { %v1574_v48 = vadd.f32 %v1880_v24, %v1573_v47 }
 0x65f   : > { %v1597_v51 = vmax.f32 %v1579_v40, 0.0 }
 0x660   : > { %v1596_v49 = vmax.f32 %v1574_v48, 0.0  ;;  %v2249_v50 = vpop.f32.mrb[22].mxu0 }
 0x661   : > { %v1589_v54 = vadd.f32 %v2249_v50, %v1880_v24  ;;  %v1583_v55 = vpop.f32.mrb[23].mxu0 }
 0x662   : > { %v1584_v3 = vadd.f32 %v1880_v24, %v1583_v55  ;;  %2288 = vmatprep.mubr.f32.mxu1 %v1596_v49 }
 0x663   : > { %2289 = vmatmul.mubr.f32.gmra.mrb[20].mxu1 %v1597_v51  ;;  %v1599_v8 = vmax.f32 %v1589_v54, 0.0 }
 0x664   : > { %v1598_v4 = vmax.f32 %v1584_v3, 0.0 }
 0x666   : > { %2291 = vmatprep.mubr.f32.mxu1 %v1598_v4 }
 0x667   : > { %2292 = vmatmul.mubr.f32.gmra.mrb[22].mxu1 %v1599_v8 }
 0x726   : > { %v2284_v9 = vpop.f32.mrb[16].mxu1 }
 0x727   : > { %v1722_v12 = vadd.f32 %v2284_v9, %v3297_v35  ;;  %v1682_v14 = vpop.f32.mrb[17].mxu1 }
 0x728   : > { %v1721_v17 = vadd.f32 %v1682_v14, %v3300_v28 }
 0x729   : > { %v1737_v53 = vadd.f32 %v1881_v10, %v1722_v12 }
 0x72a   : > { %v1736_v20 = vadd.f32 %v1881_v10, %v1721_v17 }
 0x72b   : > { %1745 = vst.msk [vmem:[%s513_s14 + $0x8] sm:$0xff] %vm522_vm0, %v1737_v53 }
 0x72c   : > { %1744 = vst.msk [vmem:[%s513_s14] sm:$0xff] %vm522_vm0, %v1736_v20 }
 0x72e   : > { %v2287_v56 = vpop.f32.mrb[18].mxu1 }
 0x72f   : > { %v1724_v31 = vadd.f32 %v2287_v56, %v3317_v43  ;;  %v1692_v23 = vpop.f32.mrb[19].mxu1 }
 0x730   : > { %v1723_v35 = vadd.f32 %v1692_v23, %v3320_v16 }
 0x731   : > { %v1739_v25 = vadd.f32 %v1881_v10, %v1724_v31 }
 0x732   : > { %v1738_v1 = vadd.f32 %v1881_v10, %v1723_v35 }
 0x733   : > { %1747 = vst.msk [vmem:[%s513_s14 + $0x18] sm:$0xff] %vm522_vm0, %v1739_v25 }
 0x734   : > { %1746 = vst.msk [vmem:[%s513_s14 + $0x10] sm:$0xff] %vm522_vm0, %v1738_v1 }
 0x736   : > { %v2290_v44 = vpop.f32.mrb[20].mxu1 }
 0x737   : > { %v1726_v28 = vadd.f32 %v2290_v44, %v3337_v2  ;;  %v1702_v57 = vpop.f32.mrb[21].mxu1 }
 0x738   : > { %v1725_v26 = vadd.f32 %v1702_v57, %v3345_v15 }
 0x739   : > { %v1741_v27 = vadd.f32 %v1881_v10, %v1726_v28 }
 0x73a   : > { %v1740_v30 = vadd.f32 %v1881_v10, %v1725_v26  ;;  %v2293_v29 = vpop.f32.mrb[22].mxu1 }
 0x73b   : > { %1749 = vst.msk [vmem:[%s513_s14 + $0x28] sm:$0xff] %vm522_vm0, %v1741_v27  ;;  %v1728_v43 = vadd.f32 %v2293_v29, %v3354_v18  ;;  %v1712_v16 = vpop.f32.mrb[23].mxu1 }
 0x73c   : > { %1748 = vst.msk [vmem:[%s513_s14 + $0x20] sm:$0xff] %vm522_vm0, %v1740_v30  ;;  %v1727_v32 = vadd.f32 %v1712_v16, %v3358_v22 }
 0x73d   : > { %v1743_v33 = vadd.f32 %v1881_v10, %v1728_v43 }
 0x73e   : > { %v1742_v34 = vadd.f32 %v1881_v10, %v1727_v32 }
 0x73f   : > { %1751 = vst.msk [vmem:[%s513_s14 + $0x38] sm:$0xff] %vm522_vm0, %v1743_v33 }
 0x740   : > { %1750 = vst.msk [vmem:[%s513_s14 + $0x30] sm:$0xff] %vm522_vm0, %v1742_v34 }
 0x741 PF: > { %s3465_s26 = sld [smem:[#allocation13_spill]] }
 0x747   : > { %s26_s25 = sadd.s32 1, %s3465_s26  }
 0x748   : > { %p23_p6 = scmp.ge.s32.totalorder %s26_s25, 4  }
 0x74a   :  { %25 = sbr.rel (!%p23_p6) target bundleno = 6 (0x6), region = 123 }
 0x751   :  { %1773 = vsyncpa [#allocation3], 1 }
 0x752   :  { %1775 = vsyncpa [#allocation3 + $0x1], 1 }
 0x753   :  { %1776 = vsyncpa [#allocation5], 1 }
 0x754   :  { %1777 = vsyncpa [#allocation8], 1 }

</bundles_post_ra>
